<compile_context>
chip_gen: v7x
topology: tpu7x:2x2x1
jax: 0.10.0
libtpu: 0.0.40
codegen_flags: <defaults>
</compile_context>

<pallas_src>
import functools

import jax
import jax.numpy as jnp
from jax.experimental import pallas as pl
from jax.experimental.pallas import tpu as pltpu


def fused_unet_kernel(x_ref, mask_ref, *args, Wp, L, margin):
    """Fused 5-layer conv stack for one batch shard.

    x_ref:    (1, Cin, L)   zero-padded pitched input, L = n_img*(H+2)*(W+2), bf16
    mask_ref: (1, L) f32    1.0 at real-pixel lanes, 0.0 at halo lanes
    args:     w0, b0, ..., w4, b4, o_ref, pad_ref, im_ref
              wL: (CoutL, 9*CinL) bf16 im2col-packed weights
              bL: (CoutL, 1)      f32 bias
              o_ref:   (1, Cout_last, L)            output, pitched layout
              pad_ref: VMEM (c_max, pad_cols) bf16  padded activation + margins
              im_ref:  VMEM (9*c_max, L) bf16       im2col operand band
    """
    o_ref, pad_ref, im_ref = args[-3], args[-2], args[-1]
    wb_refs = args[:-3]
    n_layers = len(wb_refs) // 2
    m = margin

    # Real-pixel lanes of the pitched layout (halo lanes must be re-zeroed before an
    # activation is reused as the next layer's zero-padded input).
    interior = mask_ref[...] > 0.5                       # (1, L) bool

    # Layer-0 activation: wrapper already supplies the padded pitched layout, so this
    # is a single aligned, contiguous store.  No scratch zeroing is needed: margins are
    # only ever read by halo outputs, which are select-zeroed below.
    cin0 = x_ref.shape[1]
    pad_ref[0:cin0, m:m + L] = x_ref[0]

    for l in range(n_layers):
        w = wb_refs[2 * l][...]                          # (cout, 9*cin) bf16
        b = wb_refs[2 * l + 1][...]                      # (cout, 1)     f32
        cout, nine_cin = w.shape
        cin = nine_cin // 9

        # im2col: 9 shifted *contiguous* slices (pitched layout -> no per-tap masks),
        # stored straight into a persistent VMEM band (keeps vreg pressure low).
        for ky in range(3):
            for kx in range(3):
                k = ky * 3 + kx
                off = m - Wp - 1 + ky * Wp + kx          # static offset
                im_ref[k * cin:(k + 1) * cin, :] = pad_ref[0:cin, off:off + L]

        # One bf16 MXU matmul per layer, f32 accumulation, + bias.
        acc = jnp.dot(w, im_ref[0:nine_cin, :],
                      preferred_element_type=jnp.float32) + b

        if l < n_layers - 1:
            # ReLU, then zero the halo lanes.  jnp.where (not multiply): halo taps may
            # have read uninitialized margin bytes, which could be NaN as bf16.
            act = jnp.where(interior, jnp.maximum(acc, 0.0), 0.0)
            pad_ref[0:cout, m:m + L] = act.astype(pad_ref.dtype)   # aligned store
        else:
            # Final conv (out_conv, no ReLU): emit in pitched layout; wrapper slices
            # the interior, so halo-lane garbage is harmless.
            o_ref[...] = acc[None].astype(o_ref.dtype)


def pack_weight(w_oihw):
    """PyTorch OIHW (Cout, Cin, 3, 3) -> im2col matrix (Cout, 9*Cin), tap-major/channel-minor."""
    cout, cin, kh, kw = w_oihw.shape
    return jnp.transpose(w_oihw, (0, 2, 3, 1)).reshape(cout, kh * kw * cin)


def _images_per_step(batch):
    """Fold the whole batch into one grid step on single-TensorCore chips (v5e/v6e);
    keep one image per grid step elsewhere (v7x/v4 megacore -> 2 TCs via "parallel")."""
    try:
        kind = jax.devices()[0].device_kind.lower()
    except Exception:
        return 1
    single_tc = ("lite" in kind) or ("v5e" in kind) or ("v6e" in kind) or ("v6" in kind)
    return batch if single_tc else 1


def unet_forward(x_nchw, params):
    """UNet.forward (num_layers=1, quant=False). Input/output are NCHW like PyTorch."""
    B, C, H, W = x_nchw.shape
    Hp, Wp = H + 2, W + 2
    S = Hp * Wp                                   # padded pixels per image
    n_img = _images_per_step(B)
    n_steps = B // n_img
    L = n_img * S                                 # lanes per grid step

    layers = list(params["in_conv"]) + [params["out_conv"]]
    c_out = layers[-1][0].shape[0]
    c_max = max(w.shape[1] for (w, _) in layers)  # widest Cin/Cout across layers

    # Zero-padded, pitched, lane-flat, bf16 input: (n_steps, C, n_img*S).
    xp = jnp.pad(x_nchw, ((0, 0), (0, 0), (1, 1), (1, 1)))           # (B, C, Hp, Wp)
    xp = xp.reshape(n_steps, n_img, C, S).transpose(0, 2, 1, 3).reshape(n_steps, C, L)
    xp = xp.astype(jnp.bfloat16)

    # Interior mask (1.0 at real pixels, 0.0 at halo) in the same pitched layout.
    m2 = jnp.zeros((Hp, Wp), jnp.float32).at[1:H + 1, 1:W + 1].set(1.0)
    mask = jnp.tile(m2.reshape(1, S), (1, n_img))                    # (1, L)

    flat_inputs = [xp, mask]
    in_specs = [
        pl.BlockSpec((1, C, L), lambda b: (b, 0, 0)),
        pl.BlockSpec((1, L), lambda b: (0, 0)),
    ]
    for (w, bias) in layers:
        w2d = pack_weight(w).astype(jnp.bfloat16)
        b2d = bias.reshape(-1, 1).astype(jnp.float32)
        flat_inputs += [w2d, b2d]
        in_specs += [
            pl.BlockSpec(w2d.shape, lambda b: (0, 0)),   # weights stay VMEM-resident
            pl.BlockSpec(b2d.shape, lambda b: (0, 0)),
        ]

    margin = 128                                        # 128-aligned interior offset
    pad_cols = ((margin + L + Wp + 2 + 127) // 128) * 128

    kern = functools.partial(fused_unet_kernel, Wp=Wp, L=L, margin=margin)
    out = pl.pallas_call(
        kern,
        out_shape=jax.ShapeDtypeStruct((n_steps, c_out, L), x_nchw.dtype),
        grid=(n_steps,),
        in_specs=in_specs,
        out_specs=pl.BlockSpec((1, c_out, L), lambda b: (b, 0, 0)),
        scratch_shapes=[
            pltpu.VMEM((c_max, pad_cols), jnp.bfloat16),      # padded activations
            pltpu.VMEM((9 * c_max, L), jnp.bfloat16),         # im2col operand band
        ],
        compiler_params=pltpu.CompilerParams(dimension_semantics=("parallel",)),
    )(*flat_inputs)

    # Pitched -> NCHW: drop halo rows/cols (tiny wrapper-side layout plumbing).
    out = out.reshape(n_steps, c_out, n_img, Hp, Wp).transpose(0, 2, 1, 3, 4)
    out = out.reshape(B, c_out, Hp, Wp)[:, :, 1:H + 1, 1:W + 1]
    return out


def init_params(key, in_channels, out_channels):
    """Deterministic synthetic parameters matching the PyTorch module's shapes (OIHW)."""
    def conv_param(k, cin, cout):
        kw, kb = jax.random.split(k)
        w = 0.1 * jax.random.normal(kw, (cout, cin, 3, 3), jnp.float32)
        b = 0.1 * jax.random.normal(kb, (cout,), jnp.float32)
        return w, b

    keys = jax.random.split(key, 5)
    c = in_channels
    oc = in_channels * 2  # DoubleConv(in_channels, in_channels * 2)
    return {
        "in_conv": [
            conv_param(keys[0], c, oc),            # Conv2d(in, out)      + ReLU
            conv_param(keys[1], oc, oc * 2),       # Conv2d(out, 2*out)   + ReLU
            conv_param(keys[2], oc * 2, oc * 4),   # Conv2d(2*out, 4*out) + ReLU
            conv_param(keys[3], oc * 4, c),        # Conv2d(4*out, in)    + ReLU
        ],
        "out_conv": conv_param(keys[4], c, out_channels),   # Conv2d(in, out_ch), no ReLU
    }


def unet_reference(x_nchw, params, operand_dtype):
    """Pure-JAX reference (XLA convs, NCHW/OIHW).  `operand_dtype` lets us check the
    kernel both against matched bf16-operand math (tight) and full-f32 math (loose)."""
    dn = ("NCHW", "OIHW", "NCHW")

    def conv(x, w, b, relu):
        y = jax.lax.conv_general_dilated(
            x.astype(operand_dtype), w.astype(operand_dtype), (1, 1), "SAME",
            dimension_numbers=dn, preferred_element_type=jnp.float32)
        y = y + b[None, :, None, None]
        return jnp.maximum(y, 0.0) if relu else y

    x = x_nchw
    for (w, b) in params["in_conv"]:
        x = conv(x, w, b, True)
    w, b = params["out_conv"]
    return conv(x, w, b, False)


if __name__ == "__main__":
    B, C_IN, C_OUT, H, W = 2, 4, 3, 16, 16

    key = jax.random.PRNGKey(0)
    kx, kp = jax.random.split(key)
    x = jax.random.normal(kx, (B, C_IN, H, W), jnp.float32)   # NCHW, like PyTorch
    params = init_params(kp, C_IN, C_OUT)

    out = jax.block_until_ready(unet_forward(x, params))
    assert out.shape == (B, C_OUT, H, W), out.shape

    # Tight check vs. a reference using the same bf16 matmul operands / f32 accumulation.
    ref_bf16 = jax.block_until_ready(unet_reference(x, params, jnp.bfloat16))
    err_bf16 = float(jnp.max(jnp.abs(out - ref_bf16)))
    assert jnp.allclose(out, ref_bf16, rtol=2e-3, atol=2e-3), err_bf16

    # Loose sanity check vs. full-f32 reference semantics.
    ref_f32 = jax.block_until_ready(unet_reference(x, params, jnp.float32))
    err_f32 = float(jnp.max(jnp.abs(out - ref_f32)))
    assert jnp.allclose(out, ref_f32, rtol=5e-2, atol=5e-2), err_f32

    print("KERNEL_OK")
</pallas_src>

<mosaic_0001>
module attributes {stable_mosaic.version = 11 : i64} {
  func.func @fused_unet_kernel(%arg0: i32, %arg1: memref<1x4x324xbf16, #tpu.memory_space<vmem>>, %arg2: memref<1x324xf32, #tpu.memory_space<vmem>>, %arg3: memref<8x36xbf16, #tpu.memory_space<vmem>>, %arg4: memref<8x1xf32, #tpu.memory_space<vmem>>, %arg5: memref<16x72xbf16, #tpu.memory_space<vmem>>, %arg6: memref<16x1xf32, #tpu.memory_space<vmem>>, %arg7: memref<32x144xbf16, #tpu.memory_space<vmem>>, %arg8: memref<32x1xf32, #tpu.memory_space<vmem>>, %arg9: memref<4x288xbf16, #tpu.memory_space<vmem>>, %arg10: memref<4x1xf32, #tpu.memory_space<vmem>>, %arg11: memref<3x36xbf16, #tpu.memory_space<vmem>>, %arg12: memref<3x1xf32, #tpu.memory_space<vmem>>, %arg13: memref<1x3x324xf32, #tpu.memory_space<vmem>>, %arg14: memref<32x512xbf16, #tpu.memory_space<vmem>>, %arg15: memref<288x324xbf16, #tpu.memory_space<vmem>>) attributes {dimension_semantics = [#tpu.dimension_semantics<parallel>], iteration_bounds = array<i64: 2>, scalar_prefetch = 0 : i64, scratch_operands = 2 : i64, tpu.core_type = #tpu.core_type<tc>, window_params = [{transform_indices = @transform_0, window_bounds = array<i64: 1, 4, 324>}, {pipeline_mode = #tpu.pipeline_mode<synchronous>, transform_indices = @transform_1, window_bounds = array<i64: 1, 324>}, {pipeline_mode = #tpu.pipeline_mode<synchronous>, transform_indices = @transform_2, window_bounds = array<i64: 8, 36>}, {pipeline_mode = #tpu.pipeline_mode<synchronous>, transform_indices = @transform_3, window_bounds = array<i64: 8, 1>}, {pipeline_mode = #tpu.pipeline_mode<synchronous>, transform_indices = @transform_4, window_bounds = array<i64: 16, 72>}, {pipeline_mode = #tpu.pipeline_mode<synchronous>, transform_indices = @transform_5, window_bounds = array<i64: 16, 1>}, {pipeline_mode = #tpu.pipeline_mode<synchronous>, transform_indices = @transform_6, window_bounds = array<i64: 32, 144>}, {pipeline_mode = #tpu.pipeline_mode<synchronous>, transform_indices = @transform_7, window_bounds = array<i64: 32, 1>}, {pipeline_mode = #tpu.pipeline_mode<synchronous>, transform_indices = @transform_8, window_bounds = array<i64: 4, 288>}, {pipeline_mode = #tpu.pipeline_mode<synchronous>, transform_indices = @transform_9, window_bounds = array<i64: 4, 1>}, {pipeline_mode = #tpu.pipeline_mode<synchronous>, transform_indices = @transform_10, window_bounds = array<i64: 3, 36>}, {pipeline_mode = #tpu.pipeline_mode<synchronous>, transform_indices = @transform_11, window_bounds = array<i64: 3, 1>}, {transform_indices = @transform_12, window_bounds = array<i64: 1, 3, 324>}]} {
    %c0 = arith.constant 0 : index
    %c0_0 = arith.constant 0 : index
    %0 = vector.load %arg2[%c0, %c0_0] : memref<1x324xf32, #tpu.memory_space<vmem>>, vector<1x324xf32>
    %cst = arith.constant 5.000000e-01 : f32
    %1 = vector.broadcast %cst : f32 to vector<1x324xf32>
    %2 = arith.cmpf ogt, %0, %1 : vector<1x324xf32>
    %c0_1 = arith.constant 0 : index
    %c0_2 = arith.constant 0 : index
    %c0_3 = arith.constant 0 : index
    %3 = vector.load %arg1[%c0_1, %c0_2, %c0_3] : memref<1x4x324xbf16, #tpu.memory_space<vmem>>, vector<1x4x324xbf16>
    %4 = vector.shape_cast %3 : vector<1x4x324xbf16> to vector<4x324xbf16>
    %c0_4 = arith.constant 0 : index
    %c128 = arith.constant 128 : index
    %5 = vector.load %arg14[%c0_4, %c128] : memref<32x512xbf16, #tpu.memory_space<vmem>>, vector<4x324xbf16>
    tpu.vector_store %arg14[%c0_4, %c128], %4 {strides = array<i32>} : memref<32x512xbf16, #tpu.memory_space<vmem>>, vector<4x324xbf16>,
    %c0_5 = arith.constant 0 : index
    %c0_6 = arith.constant 0 : index
    %6 = vector.load %arg3[%c0_5, %c0_6] : memref<8x36xbf16, #tpu.memory_space<vmem>>, vector<8x36xbf16>
    %c0_7 = arith.constant 0 : index
    %c0_8 = arith.constant 0 : index
    %7 = vector.load %arg4[%c0_7, %c0_8] : memref<8x1xf32, #tpu.memory_space<vmem>>, vector<8x1xf32>
    %c0_9 = arith.constant 0 : index
    %c109 = arith.constant 109 : index
    %8 = vector.load %arg14[%c0_9, %c109] : memref<32x512xbf16, #tpu.memory_space<vmem>>, vector<4x324xbf16>
    %c0_10 = arith.constant 0 : index
    %c0_11 = arith.constant 0 : index
    %9 = vector.load %arg15[%c0_10, %c0_11] : memref<288x324xbf16, #tpu.memory_space<vmem>>, vector<4x324xbf16>
    tpu.vector_store %arg15[%c0_10, %c0_11], %8 {strides = array<i32>} : memref<288x324xbf16, #tpu.memory_space<vmem>>, vector<4x324xbf16>,
    %c0_12 = arith.constant 0 : index
    %c110 = arith.constant 110 : index
    %10 = vector.load %arg14[%c0_12, %c110] : memref<32x512xbf16, #tpu.memory_space<vmem>>, vector<4x324xbf16>
    %c4 = arith.constant 4 : index
    %c0_13 = arith.constant 0 : index
    %11 = vector.load %arg15[%c4, %c0_13] : memref<288x324xbf16, #tpu.memory_space<vmem>>, vector<4x324xbf16>
    tpu.vector_store %arg15[%c4, %c0_13], %10 {strides = array<i32>} : memref<288x324xbf16, #tpu.memory_space<vmem>>, vector<4x324xbf16>,
    %c0_14 = arith.constant 0 : index
    %c111 = arith.constant 111 : index
    %12 = vector.load %arg14[%c0_14, %c111] : memref<32x512xbf16, #tpu.memory_space<vmem>>, vector<4x324xbf16>
    %c8 = arith.constant 8 : index
    %c0_15 = arith.constant 0 : index
    %13 = vector.load %arg15[%c8, %c0_15] : memref<288x324xbf16, #tpu.memory_space<vmem>>, vector<4x324xbf16>
    tpu.vector_store %arg15[%c8, %c0_15], %12 {strides = array<i32>} : memref<288x324xbf16, #tpu.memory_space<vmem>>, vector<4x324xbf16>,
    %c0_16 = arith.constant 0 : index
    %c127 = arith.constant 127 : index
    %14 = vector.load %arg14[%c0_16, %c127] : memref<32x512xbf16, #tpu.memory_space<vmem>>, vector<4x324xbf16>
    %c12 = arith.constant 12 : index
    %c0_17 = arith.constant 0 : index
    %15 = vector.load %arg15[%c12, %c0_17] : memref<288x324xbf16, #tpu.memory_space<vmem>>, vector<4x324xbf16>
    tpu.vector_store %arg15[%c12, %c0_17], %14 {strides = array<i32>} : memref<288x324xbf16, #tpu.memory_space<vmem>>, vector<4x324xbf16>,
    %c0_18 = arith.constant 0 : index
    %c128_19 = arith.constant 128 : index
    %16 = vector.load %arg14[%c0_18, %c128_19] : memref<32x512xbf16, #tpu.memory_space<vmem>>, vector<4x324xbf16>
    %c16 = arith.constant 16 : index
    %c0_20 = arith.constant 0 : index
    %17 = vector.load %arg15[%c16, %c0_20] : memref<288x324xbf16, #tpu.memory_space<vmem>>, vector<4x324xbf16>
    tpu.vector_store %arg15[%c16, %c0_20], %16 {strides = array<i32>} : memref<288x324xbf16, #tpu.memory_space<vmem>>, vector<4x324xbf16>,
    %c0_21 = arith.constant 0 : index
    %c129 = arith.constant 129 : index
    %18 = vector.load %arg14[%c0_21, %c129] : memref<32x512xbf16, #tpu.memory_space<vmem>>, vector<4x324xbf16>
    %c20 = arith.constant 20 : index
    %c0_22 = arith.constant 0 : index
    %19 = vector.load %arg15[%c20, %c0_22] : memref<288x324xbf16, #tpu.memory_space<vmem>>, vector<4x324xbf16>
    tpu.vector_store %arg15[%c20, %c0_22], %18 {strides = array<i32>} : memref<288x324xbf16, #tpu.memory_space<vmem>>, vector<4x324xbf16>,
    %c0_23 = arith.constant 0 : index
    %c145 = arith.constant 145 : index
    %20 = vector.load %arg14[%c0_23, %c145] : memref<32x512xbf16, #tpu.memory_space<vmem>>, vector<4x324xbf16>
    %c24 = arith.constant 24 : index
    %c0_24 = arith.constant 0 : index
    %21 = vector.load %arg15[%c24, %c0_24] : memref<288x324xbf16, #tpu.memory_space<vmem>>, vector<4x324xbf16>
    tpu.vector_store %arg15[%c24, %c0_24], %20 {strides = array<i32>} : memref<288x324xbf16, #tpu.memory_space<vmem>>, vector<4x324xbf16>,
    %c0_25 = arith.constant 0 : index
    %c146 = arith.constant 146 : index
    %22 = vector.load %arg14[%c0_25, %c146] : memref<32x512xbf16, #tpu.memory_space<vmem>>, vector<4x324xbf16>
    %c28 = arith.constant 28 : index
    %c0_26 = arith.constant 0 : index
    %23 = vector.load %arg15[%c28, %c0_26] : memref<288x324xbf16, #tpu.memory_space<vmem>>, vector<4x324xbf16>
    tpu.vector_store %arg15[%c28, %c0_26], %22 {strides = array<i32>} : memref<288x324xbf16, #tpu.memory_space<vmem>>, vector<4x324xbf16>,
    %c0_27 = arith.constant 0 : index
    %c147 = arith.constant 147 : index
    %24 = vector.load %arg14[%c0_27, %c147] : memref<32x512xbf16, #tpu.memory_space<vmem>>, vector<4x324xbf16>
    %c32 = arith.constant 32 : index
    %c0_28 = arith.constant 0 : index
    %25 = vector.load %arg15[%c32, %c0_28] : memref<288x324xbf16, #tpu.memory_space<vmem>>, vector<4x324xbf16>
    tpu.vector_store %arg15[%c32, %c0_28], %24 {strides = array<i32>} : memref<288x324xbf16, #tpu.memory_space<vmem>>, vector<4x324xbf16>,
    %c0_29 = arith.constant 0 : index
    %c0_30 = arith.constant 0 : index
    %26 = vector.load %arg15[%c0_29, %c0_30] : memref<288x324xbf16, #tpu.memory_space<vmem>>, vector<36x324xbf16>
    %cst_31 = arith.constant dense<0.000000e+00> : vector<8x324xf32>
    %27 = tpu.matmul %6, %26, %cst_31 {dimension_numbers = #tpu.dot_dimension_numbers<[1], [0], [0], [1], [0, 0, 1, 1], [], []>} : vector<8x36xbf16>, vector<36x324xbf16>, vector<8x324xf32> -> vector<8x324xf32>
    %28 = vector.broadcast %7 : vector<8x1xf32> to vector<8x324xf32>
    %29 = arith.addf %27, %28 : vector<8x324xf32>
    %cst_32 = arith.constant 0.000000e+00 : f32
    %30 = vector.broadcast %cst_32 : f32 to vector<8x324xf32>
    %31 = arith.maximumf %29, %30 : vector<8x324xf32>
    %cst_33 = arith.constant 0.000000e+00 : f32
    %32 = vector.shape_cast %2 : vector<1x324xi1> to vector<1x324xi1>
    %33 = vector.broadcast %32 : vector<1x324xi1> to vector<8x324xi1>
    %34 = vector.broadcast %cst_33 : f32 to vector<8x324xf32>
    %35 = arith.select %33, %31, %34 : vector<8x324xi1>, vector<8x324xf32>
    %36 = arith.truncf %35 : vector<8x324xf32> to vector<8x324xbf16>
    %c0_34 = arith.constant 0 : index
    %c128_35 = arith.constant 128 : index
    %37 = vector.load %arg14[%c0_34, %c128_35] : memref<32x512xbf16, #tpu.memory_space<vmem>>, vector<8x324xbf16>
    tpu.vector_store %arg14[%c0_34, %c128_35], %36 {strides = array<i32>} : memref<32x512xbf16, #tpu.memory_space<vmem>>, vector<8x324xbf16>,
    %c0_36 = arith.constant 0 : index
    %c0_37 = arith.constant 0 : index
    %38 = vector.load %arg5[%c0_36, %c0_37] : memref<16x72xbf16, #tpu.memory_space<vmem>>, vector<16x72xbf16>
    %c0_38 = arith.constant 0 : index
    %c0_39 = arith.constant 0 : index
    %39 = vector.load %arg6[%c0_38, %c0_39] : memref<16x1xf32, #tpu.memory_space<vmem>>, vector<16x1xf32>
    %c0_40 = arith.constant 0 : index
    %c109_41 = arith.constant 109 : index
    %40 = vector.load %arg14[%c0_40, %c109_41] : memref<32x512xbf16, #tpu.memory_space<vmem>>, vector<8x324xbf16>
    %c0_42 = arith.constant 0 : index
    %c0_43 = arith.constant 0 : index
    %41 = vector.load %arg15[%c0_42, %c0_43] : memref<288x324xbf16, #tpu.memory_space<vmem>>, vector<8x324xbf16>
    tpu.vector_store %arg15[%c0_42, %c0_43], %40 {strides = array<i32>} : memref<288x324xbf16, #tpu.memory_space<vmem>>, vector<8x324xbf16>,
    %c0_44 = arith.constant 0 : index
    %c110_45 = arith.constant 110 : index
    %42 = vector.load %arg14[%c0_44, %c110_45] : memref<32x512xbf16, #tpu.memory_space<vmem>>, vector<8x324xbf16>
    %c8_46 = arith.constant 8 : index
    %c0_47 = arith.constant 0 : index
    %43 = vector.load %arg15[%c8_46, %c0_47] : memref<288x324xbf16, #tpu.memory_space<vmem>>, vector<8x324xbf16>
    tpu.vector_store %arg15[%c8_46, %c0_47], %42 {strides = array<i32>} : memref<288x324xbf16, #tpu.memory_space<vmem>>, vector<8x324xbf16>,
    %c0_48 = arith.constant 0 : index
    %c111_49 = arith.constant 111 : index
    %44 = vector.load %arg14[%c0_48, %c111_49] : memref<32x512xbf16, #tpu.memory_space<vmem>>, vector<8x324xbf16>
    %c16_50 = arith.constant 16 : index
    %c0_51 = arith.constant 0 : index
    %45 = vector.load %arg15[%c16_50, %c0_51] : memref<288x324xbf16, #tpu.memory_space<vmem>>, vector<8x324xbf16>
    tpu.vector_store %arg15[%c16_50, %c0_51], %44 {strides = array<i32>} : memref<288x324xbf16, #tpu.memory_space<vmem>>, vector<8x324xbf16>,
    %c0_52 = arith.constant 0 : index
    %c127_53 = arith.constant 127 : index
    %46 = vector.load %arg14[%c0_52, %c127_53] : memref<32x512xbf16, #tpu.memory_space<vmem>>, vector<8x324xbf16>
    %c24_54 = arith.constant 24 : index
    %c0_55 = arith.constant 0 : index
    %47 = vector.load %arg15[%c24_54, %c0_55] : memref<288x324xbf16, #tpu.memory_space<vmem>>, vector<8x324xbf16>
    tpu.vector_store %arg15[%c24_54, %c0_55], %46 {strides = array<i32>} : memref<288x324xbf16, #tpu.memory_space<vmem>>, vector<8x324xbf16>,
    %c0_56 = arith.constant 0 : index
    %c128_57 = arith.constant 128 : index
    %48 = vector.load %arg14[%c0_56, %c128_57] : memref<32x512xbf16, #tpu.memory_space<vmem>>, vector<8x324xbf16>
    %c32_58 = arith.constant 32 : index
    %c0_59 = arith.constant 0 : index
    %49 = vector.load %arg15[%c32_58, %c0_59] : memref<288x324xbf16, #tpu.memory_space<vmem>>, vector<8x324xbf16>
    tpu.vector_store %arg15[%c32_58, %c0_59], %48 {strides = array<i32>} : memref<288x324xbf16, #tpu.memory_space<vmem>>, vector<8x324xbf16>,
    %c0_60 = arith.constant 0 : index
    %c129_61 = arith.constant 129 : index
    %50 = vector.load %arg14[%c0_60, %c129_61] : memref<32x512xbf16, #tpu.memory_space<vmem>>, vector<8x324xbf16>
    %c40 = arith.constant 40 : index
    %c0_62 = arith.constant 0 : index
    %51 = vector.load %arg15[%c40, %c0_62] : memref<288x324xbf16, #tpu.memory_space<vmem>>, vector<8x324xbf16>
    tpu.vector_store %arg15[%c40, %c0_62], %50 {strides = array<i32>} : memref<288x324xbf16, #tpu.memory_space<vmem>>, vector<8x324xbf16>,
    %c0_63 = arith.constant 0 : index
    %c145_64 = arith.constant 145 : index
    %52 = vector.load %arg14[%c0_63, %c145_64] : memref<32x512xbf16, #tpu.memory_space<vmem>>, vector<8x324xbf16>
    %c48 = arith.constant 48 : index
    %c0_65 = arith.constant 0 : index
    %53 = vector.load %arg15[%c48, %c0_65] : memref<288x324xbf16, #tpu.memory_space<vmem>>, vector<8x324xbf16>
    tpu.vector_store %arg15[%c48, %c0_65], %52 {strides = array<i32>} : memref<288x324xbf16, #tpu.memory_space<vmem>>, vector<8x324xbf16>,
    %c0_66 = arith.constant 0 : index
    %c146_67 = arith.constant 146 : index
    %54 = vector.load %arg14[%c0_66, %c146_67] : memref<32x512xbf16, #tpu.memory_space<vmem>>, vector<8x324xbf16>
    %c56 = arith.constant 56 : index
    %c0_68 = arith.constant 0 : index
    %55 = vector.load %arg15[%c56, %c0_68] : memref<288x324xbf16, #tpu.memory_space<vmem>>, vector<8x324xbf16>
    tpu.vector_store %arg15[%c56, %c0_68], %54 {strides = array<i32>} : memref<288x324xbf16, #tpu.memory_space<vmem>>, vector<8x324xbf16>,
    %c0_69 = arith.constant 0 : index
    %c147_70 = arith.constant 147 : index
    %56 = vector.load %arg14[%c0_69, %c147_70] : memref<32x512xbf16, #tpu.memory_space<vmem>>, vector<8x324xbf16>
    %c64 = arith.constant 64 : index
    %c0_71 = arith.constant 0 : index
    %57 = vector.load %arg15[%c64, %c0_71] : memref<288x324xbf16, #tpu.memory_space<vmem>>, vector<8x324xbf16>
    tpu.vector_store %arg15[%c64, %c0_71], %56 {strides = array<i32>} : memref<288x324xbf16, #tpu.memory_space<vmem>>, vector<8x324xbf16>,
    %c0_72 = arith.constant 0 : index
    %c0_73 = arith.constant 0 : index
    %58 = vector.load %arg15[%c0_72, %c0_73] : memref<288x324xbf16, #tpu.memory_space<vmem>>, vector<72x324xbf16>
    %cst_74 = arith.constant dense<0.000000e+00> : vector<16x324xf32>
    %59 = tpu.matmul %38, %58, %cst_74 {dimension_numbers = #tpu.dot_dimension_numbers<[1], [0], [0], [1], [0, 0, 1, 1], [], []>} : vector<16x72xbf16>, vector<72x324xbf16>, vector<16x324xf32> -> vector<16x324xf32>
    %60 = vector.broadcast %39 : vector<16x1xf32> to vector<16x324xf32>
    %61 = arith.addf %59, %60 : vector<16x324xf32>
    %cst_75 = arith.constant 0.000000e+00 : f32
    %62 = vector.broadcast %cst_75 : f32 to vector<16x324xf32>
    %63 = arith.maximumf %61, %62 : vector<16x324xf32>
    %cst_76 = arith.constant 0.000000e+00 : f32
    %64 = vector.shape_cast %2 : vector<1x324xi1> to vector<1x324xi1>
    %65 = vector.broadcast %64 : vector<1x324xi1> to vector<16x324xi1>
    %66 = vector.broadcast %cst_76 : f32 to vector<16x324xf32>
    %67 = arith.select %65, %63, %66 : vector<16x324xi1>, vector<16x324xf32>
    %68 = arith.truncf %67 : vector<16x324xf32> to vector<16x324xbf16>
    %c0_77 = arith.constant 0 : index
    %c128_78 = arith.constant 128 : index
    %69 = vector.load %arg14[%c0_77, %c128_78] : memref<32x512xbf16, #tpu.memory_space<vmem>>, vector<16x324xbf16>
    tpu.vector_store %arg14[%c0_77, %c128_78], %68 {strides = array<i32>} : memref<32x512xbf16, #tpu.memory_space<vmem>>, vector<16x324xbf16>,
    %c0_79 = arith.constant 0 : index
    %c0_80 = arith.constant 0 : index
    %70 = vector.load %arg7[%c0_79, %c0_80] : memref<32x144xbf16, #tpu.memory_space<vmem>>, vector<32x144xbf16>
    %c0_81 = arith.constant 0 : index
    %c0_82 = arith.constant 0 : index
    %71 = vector.load %arg8[%c0_81, %c0_82] : memref<32x1xf32, #tpu.memory_space<vmem>>, vector<32x1xf32>
    %c0_83 = arith.constant 0 : index
    %c109_84 = arith.constant 109 : index
    %72 = vector.load %arg14[%c0_83, %c109_84] : memref<32x512xbf16, #tpu.memory_space<vmem>>, vector<16x324xbf16>
    %c0_85 = arith.constant 0 : index
    %c0_86 = arith.constant 0 : index
    %73 = vector.load %arg15[%c0_85, %c0_86] : memref<288x324xbf16, #tpu.memory_space<vmem>>, vector<16x324xbf16>
    tpu.vector_store %arg15[%c0_85, %c0_86], %72 {strides = array<i32>} : memref<288x324xbf16, #tpu.memory_space<vmem>>, vector<16x324xbf16>,
    %c0_87 = arith.constant 0 : index
    %c110_88 = arith.constant 110 : index
    %74 = vector.load %arg14[%c0_87, %c110_88] : memref<32x512xbf16, #tpu.memory_space<vmem>>, vector<16x324xbf16>
    %c16_89 = arith.constant 16 : index
    %c0_90 = arith.constant 0 : index
    %75 = vector.load %arg15[%c16_89, %c0_90] : memref<288x324xbf16, #tpu.memory_space<vmem>>, vector<16x324xbf16>
    tpu.vector_store %arg15[%c16_89, %c0_90], %74 {strides = array<i32>} : memref<288x324xbf16, #tpu.memory_space<vmem>>, vector<16x324xbf16>,
    %c0_91 = arith.constant 0 : index
    %c111_92 = arith.constant 111 : index
    %76 = vector.load %arg14[%c0_91, %c111_92] : memref<32x512xbf16, #tpu.memory_space<vmem>>, vector<16x324xbf16>
    %c32_93 = arith.constant 32 : index
    %c0_94 = arith.constant 0 : index
    %77 = vector.load %arg15[%c32_93, %c0_94] : memref<288x324xbf16, #tpu.memory_space<vmem>>, vector<16x324xbf16>
    tpu.vector_store %arg15[%c32_93, %c0_94], %76 {strides = array<i32>} : memref<288x324xbf16, #tpu.memory_space<vmem>>, vector<16x324xbf16>,
    %c0_95 = arith.constant 0 : index
    %c127_96 = arith.constant 127 : index
    %78 = vector.load %arg14[%c0_95, %c127_96] : memref<32x512xbf16, #tpu.memory_space<vmem>>, vector<16x324xbf16>
    %c48_97 = arith.constant 48 : index
    %c0_98 = arith.constant 0 : index
    %79 = vector.load %arg15[%c48_97, %c0_98] : memref<288x324xbf16, #tpu.memory_space<vmem>>, vector<16x324xbf16>
    tpu.vector_store %arg15[%c48_97, %c0_98], %78 {strides = array<i32>} : memref<288x324xbf16, #tpu.memory_space<vmem>>, vector<16x324xbf16>,
    %c0_99 = arith.constant 0 : index
    %c128_100 = arith.constant 128 : index
    %80 = vector.load %arg14[%c0_99, %c128_100] : memref<32x512xbf16, #tpu.memory_space<vmem>>, vector<16x324xbf16>
    %c64_101 = arith.constant 64 : index
    %c0_102 = arith.constant 0 : index
    %81 = vector.load %arg15[%c64_101, %c0_102] : memref<288x324xbf16, #tpu.memory_space<vmem>>, vector<16x324xbf16>
    tpu.vector_store %arg15[%c64_101, %c0_102], %80 {strides = array<i32>} : memref<288x324xbf16, #tpu.memory_space<vmem>>, vector<16x324xbf16>,
    %c0_103 = arith.constant 0 : index
    %c129_104 = arith.constant 129 : index
    %82 = vector.load %arg14[%c0_103, %c129_104] : memref<32x512xbf16, #tpu.memory_space<vmem>>, vector<16x324xbf16>
    %c80 = arith.constant 80 : index
    %c0_105 = arith.constant 0 : index
    %83 = vector.load %arg15[%c80, %c0_105] : memref<288x324xbf16, #tpu.memory_space<vmem>>, vector<16x324xbf16>
    tpu.vector_store %arg15[%c80, %c0_105], %82 {strides = array<i32>} : memref<288x324xbf16, #tpu.memory_space<vmem>>, vector<16x324xbf16>,
    %c0_106 = arith.constant 0 : index
    %c145_107 = arith.constant 145 : index
    %84 = vector.load %arg14[%c0_106, %c145_107] : memref<32x512xbf16, #tpu.memory_space<vmem>>, vector<16x324xbf16>
    %c96 = arith.constant 96 : index
    %c0_108 = arith.constant 0 : index
    %85 = vector.load %arg15[%c96, %c0_108] : memref<288x324xbf16, #tpu.memory_space<vmem>>, vector<16x324xbf16>
    tpu.vector_store %arg15[%c96, %c0_108], %84 {strides = array<i32>} : memref<288x324xbf16, #tpu.memory_space<vmem>>, vector<16x324xbf16>,
    %c0_109 = arith.constant 0 : index
    %c146_110 = arith.constant 146 : index
    %86 = vector.load %arg14[%c0_109, %c146_110] : memref<32x512xbf16, #tpu.memory_space<vmem>>, vector<16x324xbf16>
    %c112 = arith.constant 112 : index
    %c0_111 = arith.constant 0 : index
    %87 = vector.load %arg15[%c112, %c0_111] : memref<288x324xbf16, #tpu.memory_space<vmem>>, vector<16x324xbf16>
    tpu.vector_store %arg15[%c112, %c0_111], %86 {strides = array<i32>} : memref<288x324xbf16, #tpu.memory_space<vmem>>, vector<16x324xbf16>,
    %c0_112 = arith.constant 0 : index
    %c147_113 = arith.constant 147 : index
    %88 = vector.load %arg14[%c0_112, %c147_113] : memref<32x512xbf16, #tpu.memory_space<vmem>>, vector<16x324xbf16>
    %c128_114 = arith.constant 128 : index
    %c0_115 = arith.constant 0 : index
    %89 = vector.load %arg15[%c128_114, %c0_115] : memref<288x324xbf16, #tpu.memory_space<vmem>>, vector<16x324xbf16>
    tpu.vector_store %arg15[%c128_114, %c0_115], %88 {strides = array<i32>} : memref<288x324xbf16, #tpu.memory_space<vmem>>, vector<16x324xbf16>,
    %c0_116 = arith.constant 0 : index
    %c0_117 = arith.constant 0 : index
    %90 = vector.load %arg15[%c0_116, %c0_117] : memref<288x324xbf16, #tpu.memory_space<vmem>>, vector<144x324xbf16>
    %cst_118 = arith.constant dense<0.000000e+00> : vector<32x324xf32>
    %91 = tpu.matmul %70, %90, %cst_118 {dimension_numbers = #tpu.dot_dimension_numbers<[1], [0], [0], [1], [0, 0, 1, 1], [], []>} : vector<32x144xbf16>, vector<144x324xbf16>, vector<32x324xf32> -> vector<32x324xf32>
    %92 = vector.broadcast %71 : vector<32x1xf32> to vector<32x324xf32>
    %93 = arith.addf %91, %92 : vector<32x324xf32>
    %cst_119 = arith.constant 0.000000e+00 : f32
    %94 = vector.broadcast %cst_119 : f32 to vector<32x324xf32>
    %95 = arith.maximumf %93, %94 : vector<32x324xf32>
    %cst_120 = arith.constant 0.000000e+00 : f32
    %96 = vector.shape_cast %2 : vector<1x324xi1> to vector<1x324xi1>
    %97 = vector.broadcast %96 : vector<1x324xi1> to vector<32x324xi1>
    %98 = vector.broadcast %cst_120 : f32 to vector<32x324xf32>
    %99 = arith.select %97, %95, %98 : vector<32x324xi1>, vector<32x324xf32>
    %100 = arith.truncf %99 : vector<32x324xf32> to vector<32x324xbf16>
    %c0_121 = arith.constant 0 : index
    %c128_122 = arith.constant 128 : index
    %101 = vector.load %arg14[%c0_121, %c128_122] : memref<32x512xbf16, #tpu.memory_space<vmem>>, vector<32x324xbf16>
    tpu.vector_store %arg14[%c0_121, %c128_122], %100 {strides = array<i32>} : memref<32x512xbf16, #tpu.memory_space<vmem>>, vector<32x324xbf16>,
    %c0_123 = arith.constant 0 : index
    %c0_124 = arith.constant 0 : index
    %102 = vector.load %arg9[%c0_123, %c0_124] : memref<4x288xbf16, #tpu.memory_space<vmem>>, vector<4x288xbf16>
    %c0_125 = arith.constant 0 : index
    %c0_126 = arith.constant 0 : index
    %103 = vector.load %arg10[%c0_125, %c0_126] : memref<4x1xf32, #tpu.memory_space<vmem>>, vector<4x1xf32>
    %c0_127 = arith.constant 0 : index
    %c109_128 = arith.constant 109 : index
    %104 = vector.load %arg14[%c0_127, %c109_128] : memref<32x512xbf16, #tpu.memory_space<vmem>>, vector<32x324xbf16>
    %c0_129 = arith.constant 0 : index
    %c0_130 = arith.constant 0 : index
    %105 = vector.load %arg15[%c0_129, %c0_130] : memref<288x324xbf16, #tpu.memory_space<vmem>>, vector<32x324xbf16>
    tpu.vector_store %arg15[%c0_129, %c0_130], %104 {strides = array<i32>} : memref<288x324xbf16, #tpu.memory_space<vmem>>, vector<32x324xbf16>,
    %c0_131 = arith.constant 0 : index
    %c110_132 = arith.constant 110 : index
    %106 = vector.load %arg14[%c0_131, %c110_132] : memref<32x512xbf16, #tpu.memory_space<vmem>>, vector<32x324xbf16>
    %c32_133 = arith.constant 32 : index
    %c0_134 = arith.constant 0 : index
    %107 = vector.load %arg15[%c32_133, %c0_134] : memref<288x324xbf16, #tpu.memory_space<vmem>>, vector<32x324xbf16>
    tpu.vector_store %arg15[%c32_133, %c0_134], %106 {strides = array<i32>} : memref<288x324xbf16, #tpu.memory_space<vmem>>, vector<32x324xbf16>,
    %c0_135 = arith.constant 0 : index
    %c111_136 = arith.constant 111 : index
    %108 = vector.load %arg14[%c0_135, %c111_136] : memref<32x512xbf16, #tpu.memory_space<vmem>>, vector<32x324xbf16>
    %c64_137 = arith.constant 64 : index
    %c0_138 = arith.constant 0 : index
    %109 = vector.load %arg15[%c64_137, %c0_138] : memref<288x324xbf16, #tpu.memory_space<vmem>>, vector<32x324xbf16>
    tpu.vector_store %arg15[%c64_137, %c0_138], %108 {strides = array<i32>} : memref<288x324xbf16, #tpu.memory_space<vmem>>, vector<32x324xbf16>,
    %c0_139 = arith.constant 0 : index
    %c127_140 = arith.constant 127 : index
    %110 = vector.load %arg14[%c0_139, %c127_140] : memref<32x512xbf16, #tpu.memory_space<vmem>>, vector<32x324xbf16>
    %c96_141 = arith.constant 96 : index
    %c0_142 = arith.constant 0 : index
    %111 = vector.load %arg15[%c96_141, %c0_142] : memref<288x324xbf16, #tpu.memory_space<vmem>>, vector<32x324xbf16>
    tpu.vector_store %arg15[%c96_141, %c0_142], %110 {strides = array<i32>} : memref<288x324xbf16, #tpu.memory_space<vmem>>, vector<32x324xbf16>,
    %c0_143 = arith.constant 0 : index
    %c128_144 = arith.constant 128 : index
    %112 = vector.load %arg14[%c0_143, %c128_144] : memref<32x512xbf16, #tpu.memory_space<vmem>>, vector<32x324xbf16>
    %c128_145 = arith.constant 128 : index
    %c0_146 = arith.constant 0 : index
    %113 = vector.load %arg15[%c128_145, %c0_146] : memref<288x324xbf16, #tpu.memory_space<vmem>>, vector<32x324xbf16>
    tpu.vector_store %arg15[%c128_145, %c0_146], %112 {strides = array<i32>} : memref<288x324xbf16, #tpu.memory_space<vmem>>, vector<32x324xbf16>,
    %c0_147 = arith.constant 0 : index
    %c129_148 = arith.constant 129 : index
    %114 = vector.load %arg14[%c0_147, %c129_148] : memref<32x512xbf16, #tpu.memory_space<vmem>>, vector<32x324xbf16>
    %c160 = arith.constant 160 : index
    %c0_149 = arith.constant 0 : index
    %115 = vector.load %arg15[%c160, %c0_149] : memref<288x324xbf16, #tpu.memory_space<vmem>>, vector<32x324xbf16>
    tpu.vector_store %arg15[%c160, %c0_149], %114 {strides = array<i32>} : memref<288x324xbf16, #tpu.memory_space<vmem>>, vector<32x324xbf16>,
    %c0_150 = arith.constant 0 : index
    %c145_151 = arith.constant 145 : index
    %116 = vector.load %arg14[%c0_150, %c145_151] : memref<32x512xbf16, #tpu.memory_space<vmem>>, vector<32x324xbf16>
    %c192 = arith.constant 192 : index
    %c0_152 = arith.constant 0 : index
    %117 = vector.load %arg15[%c192, %c0_152] : memref<288x324xbf16, #tpu.memory_space<vmem>>, vector<32x324xbf16>
    tpu.vector_store %arg15[%c192, %c0_152], %116 {strides = array<i32>} : memref<288x324xbf16, #tpu.memory_space<vmem>>, vector<32x324xbf16>,
    %c0_153 = arith.constant 0 : index
    %c146_154 = arith.constant 146 : index
    %118 = vector.load %arg14[%c0_153, %c146_154] : memref<32x512xbf16, #tpu.memory_space<vmem>>, vector<32x324xbf16>
    %c224 = arith.constant 224 : index
    %c0_155 = arith.constant 0 : index
    %119 = vector.load %arg15[%c224, %c0_155] : memref<288x324xbf16, #tpu.memory_space<vmem>>, vector<32x324xbf16>
    tpu.vector_store %arg15[%c224, %c0_155], %118 {strides = array<i32>} : memref<288x324xbf16, #tpu.memory_space<vmem>>, vector<32x324xbf16>,
    %c0_156 = arith.constant 0 : index
    %c147_157 = arith.constant 147 : index
    %120 = vector.load %arg14[%c0_156, %c147_157] : memref<32x512xbf16, #tpu.memory_space<vmem>>, vector<32x324xbf16>
    %c256 = arith.constant 256 : index
    %c0_158 = arith.constant 0 : index
    %121 = vector.load %arg15[%c256, %c0_158] : memref<288x324xbf16, #tpu.memory_space<vmem>>, vector<32x324xbf16>
    tpu.vector_store %arg15[%c256, %c0_158], %120 {strides = array<i32>} : memref<288x324xbf16, #tpu.memory_space<vmem>>, vector<32x324xbf16>,
    %c0_159 = arith.constant 0 : index
    %c0_160 = arith.constant 0 : index
    %122 = vector.load %arg15[%c0_159, %c0_160] : memref<288x324xbf16, #tpu.memory_space<vmem>>, vector<288x324xbf16>
    %cst_161 = arith.constant dense<0.000000e+00> : vector<4x324xf32>
    %123 = tpu.matmul %102, %122, %cst_161 {dimension_numbers = #tpu.dot_dimension_numbers<[1], [0], [0], [1], [0, 0, 1, 1], [], []>} : vector<4x288xbf16>, vector<288x324xbf16>, vector<4x324xf32> -> vector<4x324xf32>
    %124 = vector.broadcast %103 : vector<4x1xf32> to vector<4x324xf32>
    %125 = arith.addf %123, %124 : vector<4x324xf32>
    %cst_162 = arith.constant 0.000000e+00 : f32
    %126 = vector.broadcast %cst_162 : f32 to vector<4x324xf32>
    %127 = arith.maximumf %125, %126 : vector<4x324xf32>
    %cst_163 = arith.constant 0.000000e+00 : f32
    %128 = vector.shape_cast %2 : vector<1x324xi1> to vector<1x324xi1>
    %129 = vector.broadcast %128 : vector<1x324xi1> to vector<4x324xi1>
    %130 = vector.broadcast %cst_163 : f32 to vector<4x324xf32>
    %131 = arith.select %129, %127, %130 : vector<4x324xi1>, vector<4x324xf32>
    %132 = arith.truncf %131 : vector<4x324xf32> to vector<4x324xbf16>
    %c0_164 = arith.constant 0 : index
    %c128_165 = arith.constant 128 : index
    %133 = vector.load %arg14[%c0_164, %c128_165] : memref<32x512xbf16, #tpu.memory_space<vmem>>, vector<4x324xbf16>
    tpu.vector_store %arg14[%c0_164, %c128_165], %132 {strides = array<i32>} : memref<32x512xbf16, #tpu.memory_space<vmem>>, vector<4x324xbf16>,
    %c0_166 = arith.constant 0 : index
    %c0_167 = arith.constant 0 : index
    %134 = vector.load %arg11[%c0_166, %c0_167] : memref<3x36xbf16, #tpu.memory_space<vmem>>, vector<3x36xbf16>
    %c0_168 = arith.constant 0 : index
    %c0_169 = arith.constant 0 : index
    %135 = vector.load %arg12[%c0_168, %c0_169] : memref<3x1xf32, #tpu.memory_space<vmem>>, vector<3x1xf32>
    %c0_170 = arith.constant 0 : index
    %c109_171 = arith.constant 109 : index
    %136 = vector.load %arg14[%c0_170, %c109_171] : memref<32x512xbf16, #tpu.memory_space<vmem>>, vector<4x324xbf16>
    %c0_172 = arith.constant 0 : index
    %c0_173 = arith.constant 0 : index
    %137 = vector.load %arg15[%c0_172, %c0_173] : memref<288x324xbf16, #tpu.memory_space<vmem>>, vector<4x324xbf16>
    tpu.vector_store %arg15[%c0_172, %c0_173], %136 {strides = array<i32>} : memref<288x324xbf16, #tpu.memory_space<vmem>>, vector<4x324xbf16>,
    %c0_174 = arith.constant 0 : index
    %c110_175 = arith.constant 110 : index
    %138 = vector.load %arg14[%c0_174, %c110_175] : memref<32x512xbf16, #tpu.memory_space<vmem>>, vector<4x324xbf16>
    %c4_176 = arith.constant 4 : index
    %c0_177 = arith.constant 0 : index
    %139 = vector.load %arg15[%c4_176, %c0_177] : memref<288x324xbf16, #tpu.memory_space<vmem>>, vector<4x324xbf16>
    tpu.vector_store %arg15[%c4_176, %c0_177], %138 {strides = array<i32>} : memref<288x324xbf16, #tpu.memory_space<vmem>>, vector<4x324xbf16>,
    %c0_178 = arith.constant 0 : index
    %c111_179 = arith.constant 111 : index
    %140 = vector.load %arg14[%c0_178, %c111_179] : memref<32x512xbf16, #tpu.memory_space<vmem>>, vector<4x324xbf16>
    %c8_180 = arith.constant 8 : index
    %c0_181 = arith.constant 0 : index
    %141 = vector.load %arg15[%c8_180, %c0_181] : memref<288x324xbf16, #tpu.memory_space<vmem>>, vector<4x324xbf16>
    tpu.vector_store %arg15[%c8_180, %c0_181], %140 {strides = array<i32>} : memref<288x324xbf16, #tpu.memory_space<vmem>>, vector<4x324xbf16>,
    %c0_182 = arith.constant 0 : index
    %c127_183 = arith.constant 127 : index
    %142 = vector.load %arg14[%c0_182, %c127_183] : memref<32x512xbf16, #tpu.memory_space<vmem>>, vector<4x324xbf16>
    %c12_184 = arith.constant 12 : index
    %c0_185 = arith.constant 0 : index
    %143 = vector.load %arg15[%c12_184, %c0_185] : memref<288x324xbf16, #tpu.memory_space<vmem>>, vector<4x324xbf16>
    tpu.vector_store %arg15[%c12_184, %c0_185], %142 {strides = array<i32>} : memref<288x324xbf16, #tpu.memory_space<vmem>>, vector<4x324xbf16>,
    %c0_186 = arith.constant 0 : index
    %c128_187 = arith.constant 128 : index
    %144 = vector.load %arg14[%c0_186, %c128_187] : memref<32x512xbf16, #tpu.memory_space<vmem>>, vector<4x324xbf16>
    %c16_188 = arith.constant 16 : index
    %c0_189 = arith.constant 0 : index
    %145 = vector.load %arg15[%c16_188, %c0_189] : memref<288x324xbf16, #tpu.memory_space<vmem>>, vector<4x324xbf16>
    tpu.vector_store %arg15[%c16_188, %c0_189], %144 {strides = array<i32>} : memref<288x324xbf16, #tpu.memory_space<vmem>>, vector<4x324xbf16>,
    %c0_190 = arith.constant 0 : index
    %c129_191 = arith.constant 129 : index
    %146 = vector.load %arg14[%c0_190, %c129_191] : memref<32x512xbf16, #tpu.memory_space<vmem>>, vector<4x324xbf16>
    %c20_192 = arith.constant 20 : index
    %c0_193 = arith.constant 0 : index
    %147 = vector.load %arg15[%c20_192, %c0_193] : memref<288x324xbf16, #tpu.memory_space<vmem>>, vector<4x324xbf16>
    tpu.vector_store %arg15[%c20_192, %c0_193], %146 {strides = array<i32>} : memref<288x324xbf16, #tpu.memory_space<vmem>>, vector<4x324xbf16>,
    %c0_194 = arith.constant 0 : index
    %c145_195 = arith.constant 145 : index
    %148 = vector.load %arg14[%c0_194, %c145_195] : memref<32x512xbf16, #tpu.memory_space<vmem>>, vector<4x324xbf16>
    %c24_196 = arith.constant 24 : index
    %c0_197 = arith.constant 0 : index
    %149 = vector.load %arg15[%c24_196, %c0_197] : memref<288x324xbf16, #tpu.memory_space<vmem>>, vector<4x324xbf16>
    tpu.vector_store %arg15[%c24_196, %c0_197], %148 {strides = array<i32>} : memref<288x324xbf16, #tpu.memory_space<vmem>>, vector<4x324xbf16>,
    %c0_198 = arith.constant 0 : index
    %c146_199 = arith.constant 146 : index
    %150 = vector.load %arg14[%c0_198, %c146_199] : memref<32x512xbf16, #tpu.memory_space<vmem>>, vector<4x324xbf16>
    %c28_200 = arith.constant 28 : index
    %c0_201 = arith.constant 0 : index
    %151 = vector.load %arg15[%c28_200, %c0_201] : memref<288x324xbf16, #tpu.memory_space<vmem>>, vector<4x324xbf16>
    tpu.vector_store %arg15[%c28_200, %c0_201], %150 {strides = array<i32>} : memref<288x324xbf16, #tpu.memory_space<vmem>>, vector<4x324xbf16>,
    %c0_202 = arith.constant 0 : index
    %c147_203 = arith.constant 147 : index
    %152 = vector.load %arg14[%c0_202, %c147_203] : memref<32x512xbf16, #tpu.memory_space<vmem>>, vector<4x324xbf16>
    %c32_204 = arith.constant 32 : index
    %c0_205 = arith.constant 0 : index
    %153 = vector.load %arg15[%c32_204, %c0_205] : memref<288x324xbf16, #tpu.memory_space<vmem>>, vector<4x324xbf16>
    tpu.vector_store %arg15[%c32_204, %c0_205], %152 {strides = array<i32>} : memref<288x324xbf16, #tpu.memory_space<vmem>>, vector<4x324xbf16>,
    %c0_206 = arith.constant 0 : index
    %c0_207 = arith.constant 0 : index
    %154 = vector.load %arg15[%c0_206, %c0_207] : memref<288x324xbf16, #tpu.memory_space<vmem>>, vector<36x324xbf16>
    %cst_208 = arith.constant dense<0.000000e+00> : vector<3x324xf32>
    %155 = tpu.matmul %134, %154, %cst_208 {dimension_numbers = #tpu.dot_dimension_numbers<[1], [0], [0], [1], [0, 0, 1, 1], [], []>} : vector<3x36xbf16>, vector<36x324xbf16>, vector<3x324xf32> -> vector<3x324xf32>
    %156 = vector.broadcast %135 : vector<3x1xf32> to vector<3x324xf32>
    %157 = arith.addf %155, %156 : vector<3x324xf32>
    %158 = vector.shape_cast %157 : vector<3x324xf32> to vector<1x3x324xf32>
    %c0_209 = arith.constant 0 : index
    %c0_210 = arith.constant 0 : index
    %c0_211 = arith.constant 0 : index
    %159 = vector.load %arg13[%c0_209, %c0_210, %c0_211] : memref<1x3x324xf32, #tpu.memory_space<vmem>>, vector<1x3x324xf32>
    tpu.vector_store %arg13[%c0_209, %c0_210, %c0_211], %158 {strides = array<i32>} : memref<1x3x324xf32, #tpu.memory_space<vmem>>, vector<1x3x324xf32>,
    return
  }
  func.func @transform_0(%arg0: i32) -> (i32, i32, i32) {
    %c0_i32 = arith.constant 0 : i32
    %c0_i32_0 = arith.constant 0 : i32
    %c0_i32_1 = arith.constant 0 : i32
    return %arg0, %c0_i32, %c0_i32_0 : i32, i32, i32
  }
  func.func @transform_1(%arg0: i32) -> (i32, i32) {
    %c0_i32 = arith.constant 0 : i32
    %c0_i32_0 = arith.constant 0 : i32
    %c0_i32_1 = arith.constant 0 : i32
    return %c0_i32, %c0_i32_0 : i32, i32
  }
  func.func @transform_2(%arg0: i32) -> (i32, i32) {
    %c0_i32 = arith.constant 0 : i32
    %c0_i32_0 = arith.constant 0 : i32
    %c0_i32_1 = arith.constant 0 : i32
    return %c0_i32, %c0_i32_0 : i32, i32
  }
  func.func @transform_3(%arg0: i32) -> (i32, i32) {
    %c0_i32 = arith.constant 0 : i32
    %c0_i32_0 = arith.constant 0 : i32
    %c0_i32_1 = arith.constant 0 : i32
    return %c0_i32, %c0_i32_0 : i32, i32
  }
  func.func @transform_4(%arg0: i32) -> (i32, i32) {
    %c0_i32 = arith.constant 0 : i32
    %c0_i32_0 = arith.constant 0 : i32
    %c0_i32_1 = arith.constant 0 : i32
    return %c0_i32, %c0_i32_0 : i32, i32
  }
  func.func @transform_5(%arg0: i32) -> (i32, i32) {
    %c0_i32 = arith.constant 0 : i32
    %c0_i32_0 = arith.constant 0 : i32
    %c0_i32_1 = arith.constant 0 : i32
    return %c0_i32, %c0_i32_0 : i32, i32
  }
  func.func @transform_6(%arg0: i32) -> (i32, i32) {
    %c0_i32 = arith.constant 0 : i32
    %c0_i32_0 = arith.constant 0 : i32
    %c0_i32_1 = arith.constant 0 : i32
    return %c0_i32, %c0_i32_0 : i32, i32
  }
  func.func @transform_7(%arg0: i32) -> (i32, i32) {
    %c0_i32 = arith.constant 0 : i32
    %c0_i32_0 = arith.constant 0 : i32
    %c0_i32_1 = arith.constant 0 : i32
    return %c0_i32, %c0_i32_0 : i32, i32
  }
  func.func @transform_8(%arg0: i32) -> (i32, i32) {
    %c0_i32 = arith.constant 0 : i32
    %c0_i32_0 = arith.constant 0 : i32
    %c0_i32_1 = arith.constant 0 : i32
    return %c0_i32, %c0_i32_0 : i32, i32
  }
  func.func @transform_9(%arg0: i32) -> (i32, i32) {
    %c0_i32 = arith.constant 0 : i32
    %c0_i32_0 = arith.constant 0 : i32
    %c0_i32_1 = arith.constant 0 : i32
    return %c0_i32, %c0_i32_0 : i32, i32
  }
  func.func @transform_10(%arg0: i32) -> (i32, i32) {
    %c0_i32 = arith.constant 0 : i32
    %c0_i32_0 = arith.constant 0 : i32
    %c0_i32_1 = arith.constant 0 : i32
    return %c0_i32, %c0_i32_0 : i32, i32
  }
  func.func @transform_11(%arg0: i32) -> (i32, i32) {
    %c0_i32 = arith.constant 0 : i32
    %c0_i32_0 = arith.constant 0 : i32
    %c0_i32_1 = arith.constant 0 : i32
    return %c0_i32, %c0_i32_0 : i32, i32
  }
  func.func @transform_12(%arg0: i32) -> (i32, i32, i32) {
    %c0_i32 = arith.constant 0 : i32
    %c0_i32_0 = arith.constant 0 : i32
    %c0_i32_1 = arith.constant 0 : i32
    return %arg0, %c0_i32, %c0_i32_0 : i32, i32, i32
  }
}

</mosaic_0001>

<bundles_post_ra>
// kernel: tpu_custom_call.1
= control target key start
LH: loop header
LB: loop body
LE: loop exit
PB: predicated region body
PF: predicated region fallthrough
CT: control target
= control target key end

     0   :  { %s2816_s21 = smov 0   ;;  %s3643_s0 = inlined_call_operand.vmem [shape: bf16[2,4,324], index: 0, kind: input, shape index: {}]   ;;  %s3644_s1 = inlined_call_operand.vmem [shape: f32[1,324], index: 1, kind: input, shape index: {}]   ;;  %s3645_s2 = inlined_call_operand.vmem [shape: bf16[8,36], index: 2, kind: input, shape index: {}]   ;;  %s3646_s3 = inlined_call_operand.vmem [shape: f32[8,1], index: 3, kind: input, shape index: {}]   ;;  %s3647_s4 = inlined_call_operand.vmem [shape: bf16[16,72], index: 4, kind: input, shape index: {}]   ;;  %s3648_s5 = inlined_call_operand.vmem [shape: f32[16,1], index: 5, kind: input, shape index: {}]   ;;  %s3649_s6 = inlined_call_operand.vmem [shape: bf16[32,144], index: 6, kind: input, shape index: {}]   ;;  %s3650_s7 = inlined_call_operand.vmem [shape: f32[32,1], index: 7, kind: input, shape index: {}]   ;;  %s3651_s8 = inlined_call_operand.vmem [shape: bf16[4,288], index: 8, kind: input, shape index: {}]   ;;  %s3652_s9 = inlined_call_operand.vmem [shape: f32[4,1], index: 9, kind: input, shape index: {}]   ;;  %s3653_s10 = inlined_call_operand.vmem [shape: bf16[3,36], index: 10, kind: input, shape index: {}]   ;;  %s3654_s11 = inlined_call_operand.vmem [shape: f32[3,1], index: 11, kind: input, shape index: {}]   ;;  %s3655_s12 = inlined_call_operand.vmem [shape: f32[2,3,324], index: 12, kind: output, shape index: {}]  }
   0x1 LB: > { %s2564_s22 = sadd.s32 4294967295, %s2737_s21   ;;  %p2568_p0 = scmp.ge.s32.totalorder %s2737_s21, 1  ;;  %s2737_s21 = sphi %s2816_s21, %s22_s21  }
   0x2   : > { %p362_p1 = scmp.lt.s32.totalorder %s2737_s21, 3 }
   0x4   : > { %p363_p2 = pnand %p2568_p0, %p362_p1 }
   0x5   : > { %v444_v0 = vld [vmem:[#allocation2] sm:$0x3] (!%p363_p2)  ;;  %v423_v2 = vlaneseq (!%p363_p2)  ;;  %s2739_s23 = smov (!%p363_p2), 19   ;;  %p404_p3 = scmp.lt.s32.totalorder (!%p363_p2), %s2564_s22, 1  ;;  %v2741_v8 = vmov (!%p363_p2), 1983009808  }
   0x6   : > { %366 = sbr.rel (%p363_p2) target bundleno = 2093 (0x82d), region = 68  ;;  %v470_v1 = vld [vmem:[#allocation2] sm:$0x3] (!%p363_p2)  ;;  %452 = vrot.lane.b32.xlu0 (!%p363_p2), %v444_v0, %s2739_s23  ;;  %s2740_s24 = smov (!%p363_p2), 18   ;;  %v421_v9 = vunpack.c.l.s4 (!%p363_p2), %v2741_v8  ;;  %vm3661_vm0 = vcmask (!%p363_p2), 549888   ;;  %v2748_v57 = vmov (!%p363_p2), 0  }
   0x7   : > { %v478_v3 = vrot.slane (!%p363_p2), %v470_v1, 6  ;;  %v501_v4 = vld [vmem:[#allocation2] sm:$0x3] (!%p363_p2)  ;;  %v2826_v10 = vshrl.u32 (!%p363_p2), %v423_v2, 7  ;;  %s2742_s25 = smov (!%p363_p2), 17   ;;  %s2743_s27 = smov (!%p363_p2), 1   ;;  %722 = vmatprep.mubr.bf16.mxu0 (!%p363_p2), %v2748_v57  ;;  %2703 = vset.pattern.permute.xlu0 (!%p363_p2), %v2748_v57 }
   0x8   : > { %v532_v5 = vld [vmem:[#allocation2] sm:$0x3] (!%p363_p2)  ;;  %v509_v6 = vrot.slane (!%p363_p2), %v501_v4, 4  ;;  %v422_v11 = vunpack.c.0.s8 (!%p363_p2), %v421_v9  ;;  %s2744_s13 = smov (!%p363_p2), 127   ;;  %s2745_s14 = smov (!%p363_p2), 111   ;;  %2704 = vset.pattern.permute.xlu1 (!%p363_p2), %v2748_v57  ;;  %v2749_v62 = vmov (!%p363_p2), 0.0  }
   0x9   : > { %482 = vrot.lane.b32.xlu1 (!%p363_p2), %v478_v3, %s2740_s24  ;;  %v540_v7 = vrot.slane (!%p363_p2), %v532_v5, 2  ;;  %s2746_s15 = smov (!%p363_p2), 110   ;;  %s2747_s16 = smov (!%p363_p2), 109   ;;  %2633 = vmatprep.subr.bf16.mxu1 (!%p363_p2), %v2749_v62  ;;  %vm2750_vm1 = vmmov (!%p363_p2), 0   ;;  %v443_v1 = vld [vmem:[%s3646_s3] sm:$0xff] (!%p363_p2)  ;;  %vm460_vm2 = vcmask (!%p363_p2), 154624  }
   0xa   : > { %513 = vrot.lane.b32.xlu0 (!%p363_p2), %v509_v6, %s2742_s25  ;;  %v2834_v12 = vsub.s32 (!%p363_p2), %v422_v11, %v2826_v10  ;;  %2639 = vmatprep.mubr.msk.bf16.mxu1 (!%p363_p2), %vm2750_vm1, %v2749_v62  ;;  %vm490_vm3 = vcmask (!%p363_p2), 146432   ;;  %vm521_vm4 = vcmask (!%p363_p2), 138240   ;;  %vm552_vm5 = vcmask (!%p363_p2), 7168  }
   0xb   : > { %vm3660_vm6 = vcmask (!%p363_p2), 551938   ;;  %vm584_vm7 = vcmask (!%p363_p2), 1039360   ;;  %vm3659_vm8 = vcmask (!%p363_p2), 553988   ;;  %vm608_vm9 = vcmask (!%p363_p2), 908288  }
   0xc   : > { %vm3658_vm10 = vcmask (!%p363_p2), 556038   ;;  %vm632_vm11 = vcmask (!%p363_p2), 900096   ;;  %vm653_vm12 = vcmask (!%p363_p2), 891904   ;;  %vm3657_vm13 = vcmask (!%p363_p2), 1041408  }
   0xd   : > { %s3682_s22 = smov (!%p404_p3, %s2564_s22), 1  ;;  %544 = vrot.lane.b32.xlu1 %v540_v7, %s2743_s27  ;;  %vm3656_vm14 = vcmask 293888  }
   0xe   : > { %s2681_s26 = smul.u32 6, %s3682_s22 }
  0x10   : > { %s408_s30 = scalar_lea.vmem %s3643_s0, %s2681_s26 }
  0x11   : > { %v417_v13 = vld [vmem:[%s408_s30] sm:$0x3f] }
  0x12   : > { %2571 = vst.sshfl [vmem:[#allocation2 + $0x8] sm:$0x3 pattern:$0x76325410] %v417_v13  ;;  %v419_v14 = vcombine.high %v417_v13, %v417_v13  ;;  %v426_v15 = vrot.slane %v417_v13, %v2834_v12 }
  0x14   : > { %v434_v16 = vcombine.high %v426_v15, %v426_v15  ;;  %v433_v17 = vrot.slane %v419_v14, %v2834_v12 }
  0x16   : > { %439 = vst [vmem:[#allocation2 + $0x10] sm:$0x3] %v434_v16  ;;  %441 = vst.msk [vmem:[#allocation2 + $0x18] sm:$0x3] %vm3661_vm0, %v433_v17 }
  0x19   : > { %v445_v18 = vld [vmem:[#allocation2 + $0x8] sm:$0x3] }
  0x1a   : > { %v471_v19 = vld [vmem:[#allocation2 + $0x8] sm:$0x3]  ;;  %454 = vrot.lane.b32.xlu0 %v445_v18, %s2739_s23 }
  0x1b   : > { %v502_v20 = vld [vmem:[#allocation2 + $0x8] sm:$0x3]  ;;  %v479_v21 = vrot.slane %v471_v19, 6 }
  0x1c   : > { %v510_v22 = vrot.slane %v502_v20, 4  ;;  %v533_v23 = vld [vmem:[#allocation2 + $0x8] sm:$0x3] }
  0x1d   : > { %484 = vrot.lane.b32.xlu1 %v479_v21, %s2740_s24  ;;  %v472_v24 = vld [vmem:[#allocation2 + $0x10] sm:$0x3]  ;;  %v541_v27 = vrot.slane %v533_v23, 2  ;;  %v571_v33 = vld [vmem:[#allocation2 + $0x18] sm:$0x3] }
  0x1e   : > { %v503_v25 = vld [vmem:[#allocation2 + $0x10] sm:$0x3]  ;;  %515 = vrot.lane.b32.xlu0 %v510_v22, %s2742_s25  ;;  %v480_v26 = vrot.slane %v472_v24, 6  ;;  %v565_v35 = vld [vmem:[#allocation2 + $0x18] sm:$0x3]  ;;  %v577_v38 = vrot.slane %v571_v33, 6 }
  0x1f   : > { %v511_v28 = vrot.slane %v503_v25, 4  ;;  %v534_v29 = vld [vmem:[#allocation2 + $0x10] sm:$0x3]  ;;  %568 = vst.msk [vmem:[#allocation3 + $0x28] sm:$0x3] %vm3661_vm0, %v565_v35 }
  0x20   : > { %v446_v30 = vld [vmem:[#allocation2 + $0x10] sm:$0x3]  ;;  %v542_v32 = vrot.slane %v534_v29, 2  ;;  %v595_v39 = vld [vmem:[#allocation2 + $0x18] sm:$0x3] }
  0x21   : > { %486 = vrot.lane.b32.xlu1 %v480_v26, %s2740_s24  ;;  %v570_v31 = vld [vmem:[#allocation2 + $0x10] sm:$0x3]  ;;  %v601_v42 = vrot.slane %v595_v39, 4  ;;  %v619_v43 = vld [vmem:[#allocation2 + $0x18] sm:$0x3] }
  0x22   : > { %546 = vrot.lane.b32.xlu0 %v541_v27, %s2743_s27  ;;  %v576_v34 = vrot.slane %v570_v31, 6  ;;  %v594_v36 = vld [vmem:[#allocation2 + $0x10] sm:$0x3]  ;;  %v563_v44 = vld [vmem:[#allocation2 + $0x8] sm:$0x3]  ;;  %v625_v47 = vrot.slane %v619_v43, 2 }
  0x23   : > { %v564_v37 = vld [vmem:[#allocation2 + $0x10] sm:$0x3]  ;;  %v600_v40 = vrot.slane %v594_v36, 4  ;;  %566 = vst [vmem:[#allocation3 + $0x18] sm:$0x3] %v563_v44 }
  0x24   : > { %567 = vst [vmem:[#allocation3 + $0x20] sm:$0x3] %v564_v37  ;;  %v618_v41 = vld [vmem:[#allocation2 + $0x10] sm:$0x3]  ;;  %v569_v46 = vld [vmem:[#allocation2 + $0x8] sm:$0x3] }
  0x25   : > { %517 = vrot.lane.b32.xlu1 %v511_v28, %s2742_s25  ;;  %v624_v45 = vrot.slane %v618_v41, 2  ;;  %v593_v48 = vld [vmem:[#allocation2 + $0x8] sm:$0x3]  ;;  %v575_v49 = vrot.slane %v569_v46, 6  ;;  %v642_v54 = vld [vmem:[#allocation2 + $0x10] sm:$0x3] }
  0x26   : > { %456 = vrot.lane.b32.xlu0 %v446_v30, %s2739_s23  ;;  %v617_v50 = vld [vmem:[#allocation2 + $0x8] sm:$0x3]  ;;  %v599_v51 = vrot.slane %v593_v48, 4  ;;  %v643_v55 = vld [vmem:[#allocation2 + $0x18] sm:$0x3] }
  0x27   : > { %v623_v52 = vrot.slane %v617_v50, 2  ;;  %v641_v53 = vld [vmem:[#allocation2 + $0x8] sm:$0x3]  ;;  %v473_v56 = vld [vmem:[#allocation2 + $0x18] sm:$0x3] }
  0x28   : > { %v447_v58 = vld [vmem:[#allocation2 + $0x18] sm:$0x3]  ;;  %v481_v60 = vrot.slane %v473_v56, 6 }
  0x29   : > { %548 = vrot.lane.b32.xlu1 %v542_v32, %s2743_s27  ;;  %v504_v59 = vld [vmem:[#allocation2 + $0x18] sm:$0x3] }
  0x2a   : > { %580 = vrot.lane.b32.xlu0 %v576_v34, %s2744_s13  ;;  %v535_v61 = vld [vmem:[#allocation2 + $0x18] sm:$0x3]  ;;  %v512_v63 = vrot.slane %v504_v59, 4 }
  0x2b   : > { %v543_v0 = vrot.slane %v535_v61, 2 }
  0x2d   : > { %582 = vrot.lane.b32.xlu1 %v577_v38, %s2744_s13 }
  0x2e   : > { %604 = vrot.lane.b32.xlu0 %v600_v40, %s2745_s14 }
  0x31   : > { %606 = vrot.lane.b32.xlu1 %v601_v42, %s2745_s14 }
  0x32   : > { %628 = vrot.lane.b32.xlu0 %v624_v45, %s2746_s15 }
  0x35   : > { %630 = vrot.lane.b32.xlu1 %v625_v47, %s2746_s15 }
  0x36   : > { %578 = vrot.lane.b32.xlu0 %v575_v49, %s2744_s13 }
  0x39   : > { %602 = vrot.lane.b32.xlu1 %v599_v51, %s2745_s14 }
  0x3a   : > { %626 = vrot.lane.b32.xlu0 %v623_v52, %s2746_s15 }
  0x3d   : > { %647 = vrot.lane.b32.xlu1 %v641_v53, %s2747_s16 }
  0x3e   : > { %649 = vrot.lane.b32.xlu0 %v642_v54, %s2747_s16 }
  0x41   : > { %651 = vrot.lane.b32.xlu1 %v643_v55, %s2747_s16 }
  0x42   : > { %458 = vrot.lane.b32.xlu0 %v447_v58, %s2739_s23 }
  0x45   : > { %488 = vrot.lane.b32.xlu1 %v481_v60, %s2740_s24  ;;  %v442_v60 = vld [vmem:[%s3645_s2] sm:$0xf] }
  0x46   : > { %519 = vrot.lane.b32.xlu0 %v512_v63, %s2742_s25 }
  0x49   : > { %550 = vrot.lane.b32.xlu1 %v543_v0, %s2743_s27 }
  0x4a   : > { %673 = vperm.xlu0 %2703, %v443_v1  }
  0x78   : > { %v453_v2 = vpop.permute.xlu0 %452 }
  0x7b   : > { %v483_v3 = vpop.permute.xlu1 %482 }
  0x7c   : > { %v514_v4 = vpop.permute.xlu0 %513 }
  0x7f   : > { %v545_v5 = vpop.permute.xlu1 %544 }
  0x8c   : > { %v455_v6 = vpop.permute.xlu0 %454 }
  0x8d   : > { %v461_v7 = vsel %vm460_vm2, %v453_v2, %v455_v6  ;;  %v829_v2 = vld [vmem:[#allocation2] sm:$0xf] }
  0x8e   : > { %467 = vst [vmem:[#allocation3] sm:$0x3] %v461_v7  ;;  %v859_v7 = vld [vmem:[#allocation2] sm:$0xf] }
  0x8f   : > { %v485_v8 = vpop.permute.xlu1 %484 }
  0x90   : > { %v491_v9 = vsel %vm490_vm3, %v483_v3, %v485_v8  ;;  %v516_v11 = vpop.permute.xlu0 %515  ;;  %v837_v3 = vrot.slane %v829_v2, 4 }
  0x91   : > { %497 = vst [vmem:[#allocation3] sm:$0xc] %v491_v9  ;;  %v522_v13 = vsel %vm521_vm4, %v514_v4, %v516_v11  ;;  %v884_v4 = vld [vmem:[#allocation2] sm:$0xf]  ;;  %v777_v9 = vsub.s32 0, %v2826_v10 }
  0x92   : > { %528 = vst [vmem:[#allocation3] sm:$0x30] %v522_v13  ;;  %841 = vrot.lane.b32.xlu1 %v837_v3, %s2740_s24  ;;  %v781_v13 = vsub.s32 1, %v2826_v10 }
  0x93   : > { %v2879_v14 = vpop.permute.xlu1 %486 }
  0x94   : > { %v492_v15 = vsel %vm490_vm3, %v485_v8, %v2879_v14  ;;  %v547_v16 = vpop.permute.xlu0 %546  ;;  %v415_v8 = vld [vmem:[%s3644_s1] sm:$0x7] }
  0x95   : > { %498 = vst [vmem:[#allocation3 + $0x8] sm:$0xc] %v492_v15  ;;  %v553_v17 = vsel %vm552_vm5, %v545_v5, %v547_v16  ;;  %v892_v5 = vrot.slane %v884_v4, 4  ;;  %vm416_vm15 = vcmp.gt.f32.partialorder %v415_v8, 0.5 }
  0x96   : > { %559 = vst [vmem:[#allocation3] sm:$0xc0] %v553_v17 }
  0x97   : > { %v2884_v18 = vpop.permute.xlu1 %517  ;;  %896 = vrot.lane.b32.xlu1 %v892_v5, %s2743_s27 }
  0x98   : > { %v523_v19 = vsel %vm521_vm4, %v516_v11, %v2884_v18  ;;  %v457_v20 = vpop.permute.xlu0 %456  ;;  %v774_v11 = vsel %vm416_vm15, 1, %v2748_v57 }
  0x99   : > { %529 = vst [vmem:[#allocation3 + $0x8] sm:$0x30] %v523_v19  ;;  %v462_v21 = vsel %vm460_vm2, %v455_v6, %v457_v20  ;;  %v804_v6 = vld [vmem:[#allocation2] sm:$0xf] }
  0x9a   : > { %468 = vst [vmem:[#allocation3 + $0x8] sm:$0x3] %v462_v21  ;;  %812 = vrot.lane.b32.xlu0 %v804_v6, %s2739_s23 }
  0x9b   : > { %v2889_v22 = vpop.permute.xlu1 %548 }
  0x9c   : > { %v554_v23 = vsel %vm552_vm5, %v547_v16, %v2889_v22  ;;  %v581_v24 = vpop.permute.xlu0 %580  ;;  %v2942_v16 = vrot.slane %v774_v11, %v781_v13 }
  0x9d   : > { %560 = vst [vmem:[#allocation3 + $0x8] sm:$0xc0] %v554_v23  ;;  %v662_v32 = vld [vmem:[#allocation3] sm:$0xff] }
  0x9e   : > { %867 = vrot.lane.b32.xlu0 %v859_v7, %s2742_s25 }
  0x9f   : > { %v583_v25 = vpop.permute.xlu1 %582 }
  0xa0   : > { %v586_v26 = vsel %vm584_vm7, %v581_v24, %v583_v25  ;;  %592 = vst.msk [vmem:[#allocation3 + $0x28] sm:$0xc] %vm3660_vm6, %v583_v25  ;;  %v605_v27 = vpop.permute.xlu0 %604 }
  0xa1   : > { %591 = vst [vmem:[#allocation3 + $0x20] sm:$0xc] %v586_v26 }
  0xa3   : > { %v607_v28 = vpop.permute.xlu1 %606 }
  0xa4   : > { %v610_v29 = vsel %vm608_vm9, %v605_v27, %v607_v28  ;;  %616 = vst.msk [vmem:[#allocation3 + $0x28] sm:$0x30] %vm3659_vm8, %v607_v28  ;;  %v663_v30 = vld [vmem:[#allocation3 + $0x8] sm:$0xff]  ;;  %v629_v31 = vpop.permute.xlu0 %628 }
  0xa5   : > { %615 = vst [vmem:[#allocation3 + $0x20] sm:$0x30] %v610_v29  ;;  %690 = vmatprep.subr.bf16.mxu0 %v663_v30  ;;  %v785_v29 = vsub.s32 2, %v2826_v10 }
  0xa6   : > { %691 = vmatpush1.bf16.msra.mxu0 %v662_v32 }
  0xa7   : > { %v631_v33 = vpop.permute.xlu1 %630  ;;  %v2951_v30 = vrot.slane %v774_v11, %v785_v29 }
  0xa8   : > { %v634_v34 = vsel %vm632_vm11, %v629_v31, %v631_v33  ;;  %640 = vst.msk [vmem:[#allocation3 + $0x28] sm:$0xc0] %vm3658_vm10, %v631_v33  ;;  %v579_v35 = vpop.permute.xlu0 %578 }
  0xa9   : > { %639 = vst [vmem:[#allocation3 + $0x20] sm:$0xc0] %v634_v34  ;;  %v585_v36 = vsel %vm584_vm7, %v579_v35, %v581_v24  ;;  %vm789_vm15 = vcmp.eq.s32.totalorder %v2951_v30, 1 }
  0xaa   : > { %590 = vst [vmem:[#allocation3 + $0x18] sm:$0xc] %v585_v36 }
  0xab   : > { %v603_v37 = vpop.permute.xlu1 %602 }
  0xac   : > { %v609_v38 = vsel %vm608_vm9, %v603_v37, %v605_v27  ;;  %v627_v39 = vpop.permute.xlu0 %626 }
  0xad   : > { %614 = vst [vmem:[#allocation3 + $0x18] sm:$0x30] %v609_v38  ;;  %v633_v40 = vsel %vm632_vm11, %v627_v39, %v629_v31 }
  0xae   : > { %638 = vst [vmem:[#allocation3 + $0x18] sm:$0xc0] %v633_v40 }
  0xaf   : > { %v648_v41 = vpop.permute.xlu1 %647  ;;  %v667_v63 = vld [vmem:[#allocation3 + $0x28] sm:$0xff] }
  0xb0   : > { %v666_v42 = vld [vmem:[#allocation3 + $0x20] sm:$0xff]  ;;  %v650_v43 = vpop.permute.xlu0 %649 }
  0xb1   : > { %692 = vmatprep.subr.bf16.mxu0 %v666_v42  ;;  %v654_v44 = vsel %vm653_vm12, %v648_v41, %v650_v43 }
  0xb2   : > { %659 = vst [vmem:[#allocation3 + $0x30] sm:$0x3] %v654_v44 }
  0xb3   : > { %v652_v45 = vpop.permute.xlu1 %651 }
  0xb4   : > { %v655_v46 = vsel %vm653_vm12, %v650_v43, %v652_v45  ;;  %661 = vst.msk [vmem:[#allocation3 + $0x40] sm:$0x3] %vm3661_vm0, %v652_v45  ;;  %v459_v47 = vpop.permute.xlu0 %458 }
  0xb5   : > { %660 = vst [vmem:[#allocation3 + $0x38] sm:$0x3] %v655_v46  ;;  %v463_v48 = vsel %vm460_vm2, %v457_v20, %v459_v47  ;;  %v665_v49 = vld [vmem:[#allocation3 + $0x18] sm:$0xff] }
  0xb6   : > { %469 = vst.msk [vmem:[#allocation3 + $0x10] sm:$0x3] %vm3661_vm0, %v463_v48  ;;  %693 = vmatpush1.bf16.msra.mxu0 %v665_v49 }
  0xb7   : > { %v489_v50 = vpop.permute.xlu1 %488 }
  0xb8   : > { %v493_v51 = vsel %vm490_vm3, %v2879_v14, %v489_v50  ;;  %v520_v52 = vpop.permute.xlu0 %519  ;;  %v2940_v14 = vrot.slane %v774_v11, %v777_v9 }
  0xb9   : > { %500 = vst.msk [vmem:[#allocation3 + $0x10] sm:$0xc] %vm3660_vm6, %v493_v51  ;;  %v524_v53 = vsel %vm521_vm4, %v2884_v18, %v520_v52  ;;  %v668_v54 = vld [vmem:[#allocation3 + $0x30] sm:$0x3]  ;;  %vm1039_vm6 = vcmask 1043456  }
  0xba   : > { %531 = vst.msk [vmem:[#allocation3 + $0x10] sm:$0x30] %vm3659_vm8, %v524_v53  ;;  %v682_v59 = vsel %vm3657_vm13, %v668_v54, 0  ;;  %vm857_vm8 = vcmask 556036  }
  0xbb   : > { %v551_v55 = vpop.permute.xlu1 %550  ;;  %v670_v0 = vld [vmem:[#allocation3 + $0x40] sm:$0x3] }
  0xbc   : > { %v555_v56 = vsel %vm552_vm5, %v2889_v22, %v551_v55  ;;  %v669_v58 = vld [vmem:[#allocation3 + $0x38] sm:$0x3]  ;;  %v688_v1 = vsel %vm3657_vm13, %v670_v0, 0 }
  0xbd   : > { %562 = vst.msk [vmem:[#allocation3 + $0x10] sm:$0xc0] %vm3658_vm10, %v555_v56  ;;  %2572 = vmatprep.subr.msk.bf16.mxu0 %vm3657_vm13, %v669_v58  ;;  %vm788_vm13 = vcmp.eq.s32.totalorder %v2942_v16, 1  ;;  %vm798_vm10 = vcmask 551936  }
  0xbe   : > { %695 = vmatpush1.bf16.msra.mxu0 %v682_v59 }
  0xc1   : > { %2573 = vmatmul.mubr.msk.bf16.vlgmr.msra.gmra.mrb[0].mxu0 %vm3656_vm14, %v442_v60 }
  0xc2   : > { %1081 = vmatprep.mubr.bf16.mxu0 %v2748_v57 }
  0xc4   : > { %v664_v61 = vld [vmem:[#allocation3 + $0x10] sm:$0xff] }
  0xc5   : > { %2634 = vmatpush3.bf16.msra.mxu1 %v664_v61 }
  0xc6   : > { %2635 = vmatprep.subr.bf16.mxu1 %v2749_v62 }
  0xc9   : > { %2636 = vmatpush3.bf16.msra.mxu1 %v667_v63  ;;  %v674_v15 = vpop.permute.xlu0 %673 }
  0xca   : > { %2637 = vmatprep.subr.bf16.mxu1 %v2749_v62 }
  0xcd   : > { %2638 = vmatpush3.bf16.msra.mxu1 %v688_v1 }
  0xce   : > { %2643 = vmatprep.subr.bf16.mxu1 %v2749_v62 }
  0xd0   : > { %2640 = vmatmul.mubr.msk.bf16.vlgmr.msra.gmra.mrb[0].mxu1 %vm3656_vm14, %v442_v60  ;;  %vm787_vm14 = vcmp.eq.s32.totalorder %v2940_v14, 1 }
  0xd1   : > { %2653 = vmatprep.mubr.msk.bf16.mxu1 %vm2750_vm1, %v2749_v62  ;;  %vm3154_vm0 = vmpackc.low %vm787_vm14, %vm787_vm14 }
 0x194   : > { %v724_v17 = vpop.f32.mrb[0].mxu0 }
 0x195   : > { %v725_v18 = vadd.f32 %v724_v17, %v674_v15  ;;  %v726_v19 = vpop.f32.mrb[1].mxu0 }
 0x196   : > { %v727_v20 = vadd.f32 %v726_v19, %v674_v15  ;;  %v728_v21 = vpop.f32.mrb[2].mxu0  ;;  %v802_v19 = vld [vmem:[%s3648_s5] sm:$0xff] }
 0x197   : > { %v771_v22 = vmax.f32 %v725_v18, 0.0  ;;  %v729_v23 = vpop.f32.mrb[3].mxu0  ;;  %v842_v21 = vpop.permute.xlu1 %841 }
 0x198   : > { %v772_v24 = vmax.f32 %v727_v20, 0.0  ;;  %v803_v20 = vld [vmem:[%s3648_s5 + $0x8] sm:$0xff]  ;;  %v813_v23 = vpop.permute.xlu0 %812 }
 0x199   : > { %v790_v25 = vsel %vm787_vm14, %v771_v22, 0.0 }
 0x19a   : > { %v793_v26 = vpack.c.bf16 %v790_v25, %v790_v25  ;;  %v791_v27 = vsel %vm788_vm13, %v772_v24, 0.0 }
 0x19b   : > { %v794_v28 = vpack.c.bf16 %v791_v27, %v791_v27  ;;  %v897_v22 = vpop.permute.xlu1 %896 }
 0x19c   : > { %796 = vst [vmem:[#allocation2 + $0x8] sm:$0xf] %v793_v26  ;;  %v868_v29 = vpop.permute.xlu0 %867 }
 0x19d   : > { %797 = vst [vmem:[#allocation2 + $0x10] sm:$0xf] %v794_v28 }
 0x1a3   : > { %v765_v31 = vpop.f32.mrb[0].mxu1  ;;  %v805_v32 = vld [vmem:[#allocation2 + $0x8] sm:$0xf] }
 0x1a4   : > { %v766_v33 = vadd.f32 %v765_v31, %v674_v15  ;;  %v2641_v34 = vpop.f32.mrb[1].mxu1  ;;  %814 = vrot.lane.b32.xlu1 %v805_v32, %s2739_s23  ;;  %v942_v36 = vld [vmem:[#allocation2 + $0x8] sm:$0xf]  ;;  %v806_v40 = vld [vmem:[#allocation2 + $0x10] sm:$0xf] }
 0x1a5   : > { %v768_v35 = vpop.f32.mrb[2].mxu1  ;;  %v914_v41 = vld [vmem:[#allocation2 + $0x10] sm:$0xf]  ;;  %v913_v42 = vld [vmem:[#allocation2 + $0x8] sm:$0xf] }
 0x1a6   : > { %v773_v37 = vmax.f32 %v766_v33, 0.0  ;;  %v2642_v38 = vpop.f32.mrb[3].mxu1  ;;  %917 = vst [vmem:[#allocation3 + $0x38] sm:$0xf] %v914_v41  ;;  %916 = vst [vmem:[#allocation3 + $0x30] sm:$0xf] %v913_v42 }
 0x1a7   : > { %v861_v43 = vld [vmem:[#allocation2 + $0x10] sm:$0xf]  ;;  %v860_v48 = vld [vmem:[#allocation2 + $0x8] sm:$0xf] }
 0x1a8   : > { %v792_v39 = vsel %vm789_vm15, %v773_v37, 0.0  ;;  %948 = vrot.lane.b32.xlu1 %v942_v36, %s2745_s14  ;;  %v943_v50 = vld [vmem:[#allocation2 + $0x10] sm:$0xf]  ;;  %v830_v53 = vld [vmem:[#allocation2 + $0x8] sm:$0xf] }
 0x1a9   : > { %v795_v10 = vpack.c.bf16 %v792_v39, %v792_v39  ;;  %v831_v51 = vld [vmem:[#allocation2 + $0x10] sm:$0xf]  ;;  %v838_v56 = vrot.slane %v830_v53, 4  ;;  %v885_v58 = vld [vmem:[#allocation2 + $0x8] sm:$0xf] }
 0x1aa   : > { %v839_v54 = vrot.slane %v831_v51, 4  ;;  %v886_v55 = vld [vmem:[#allocation2 + $0x10] sm:$0xf]  ;;  %v893_v60 = vrot.slane %v885_v58, 4  ;;  %v919_v61 = vld [vmem:[#allocation2 + $0x8] sm:$0xf] }
 0x1ab   : > { %799 = vst.msk [vmem:[#allocation2 + $0x18] sm:$0xf] %vm798_vm10, %v795_v10  ;;  %v894_v59 = vrot.slane %v886_v55, 4  ;;  %v985_v63 = vld [vmem:[#allocation2 + $0x8] sm:$0xf]  ;;  %v925_v1 = vrot.slane %v919_v61, 4 }
 0x1ac   : > { %816 = vrot.lane.b32.xlu1 %v806_v40, %s2739_s23  ;;  %v963_v0 = vld [vmem:[#allocation2 + $0x10] sm:$0xf]  ;;  %v962_v5 = vld [vmem:[#allocation2 + $0x8] sm:$0xf] }
 0x1ad   : > { %v920_v2 = vld [vmem:[#allocation2 + $0x10] sm:$0xf]  ;;  %v969_v3 = vrot.slane %v963_v0, 4  ;;  %v968_v8 = vrot.slane %v962_v5, 4 }
 0x1ae   : > { %v926_v4 = vrot.slane %v920_v2, 4  ;;  %v986_v13 = vld [vmem:[#allocation2 + $0x10] sm:$0xf] }
 0x1b0   : > { %871 = vrot.lane.b32.xlu1 %v861_v43, %s2742_s25 }
 0x1b2   : > { %v944_v44 = vld [vmem:[#allocation2 + $0x18] sm:$0xf] }
 0x1b3   : > { %v921_v45 = vld [vmem:[#allocation2 + $0x18] sm:$0xf]  ;;  %952 = vrot.lane.b32.xlu0 %v944_v44, %s2745_s14 }
 0x1b4   : > { %v927_v46 = vrot.slane %v921_v45, 4  ;;  %v915_v47 = vld [vmem:[#allocation2 + $0x18] sm:$0xf] }
 0x1b5   : > { %v964_v49 = vld [vmem:[#allocation2 + $0x18] sm:$0xf]  ;;  %918 = vst.msk [vmem:[#allocation3 + $0x40] sm:$0xf] %vm798_vm10, %v915_v47 }
 0x1b6   : > { %932 = vrot.lane.b32.xlu1 %v927_v46, %s2744_s13  ;;  %v970_v52 = vrot.slane %v964_v49, 4  ;;  %v987_v6 = vld [vmem:[#allocation2 + $0x18] sm:$0xf] }
 0x1b7   : > { %869 = vrot.lane.b32.xlu0 %v860_v48, %s2742_s25  ;;  %v832_v7 = vld [vmem:[#allocation2 + $0x18] sm:$0xf] }
 0x1b8   : > { %v840_v9 = vrot.slane %v832_v7, 4  ;;  %v887_v11 = vld [vmem:[#allocation2 + $0x18] sm:$0xf] }
 0x1b9   : > { %v895_v15 = vrot.slane %v887_v11, 4  ;;  %v807_v17 = vld [vmem:[#allocation2 + $0x18] sm:$0xf] }
 0x1ba   : > { %950 = vrot.lane.b32.xlu1 %v943_v50, %s2745_s14  ;;  %v862_v18 = vld [vmem:[#allocation2 + $0x18] sm:$0xf] }
 0x1bb   : > { %975 = vrot.lane.b32.xlu0 %v970_v52, %s2746_s15 }
 0x1be   : > { %845 = vrot.lane.b32.xlu1 %v839_v54, %s2740_s24 }
 0x1bf   : > { %843 = vrot.lane.b32.xlu0 %v838_v56, %s2740_s24 }
 0x1c2   : > { %900 = vrot.lane.b32.xlu1 %v894_v59, %s2743_s27 }
 0x1c3   : > { %898 = vrot.lane.b32.xlu0 %v893_v60, %s2743_s27 }
 0x1c6   : > { %991 = vrot.lane.b32.xlu1 %v985_v63, %s2747_s16 }
 0x1c7   : > { %928 = vrot.lane.b32.xlu0 %v925_v1, %s2744_s13 }
 0x1ca   : > { %973 = vrot.lane.b32.xlu1 %v969_v3, %s2746_s15 }
 0x1cb   : > { %930 = vrot.lane.b32.xlu0 %v926_v4, %s2744_s13 }
 0x1ce   : > { %995 = vrot.lane.b32.xlu1 %v987_v6, %s2747_s16 }
 0x1cf   : > { %971 = vrot.lane.b32.xlu0 %v968_v8, %s2746_s15 }
 0x1d2   : > { %847 = vrot.lane.b32.xlu1 %v840_v9, %s2740_s24 }
 0x1d3   : > { %993 = vrot.lane.b32.xlu0 %v986_v13, %s2747_s16 }
 0x1d6   : > { %902 = vrot.lane.b32.xlu1 %v895_v15, %s2743_s27 }
 0x1d7   : > { %818 = vrot.lane.b32.xlu0 %v807_v17, %s2739_s23 }
 0x1da   : > { %1027 = vperm.xlu1 %2704, %v803_v20  }
 0x1db   : > { %873 = vrot.lane.b32.xlu0 %v862_v18, %s2742_s25 }
 0x1df   : > { %1022 = vperm.xlu0 %2703, %v802_v19  }
 0x216   : > { %v815_v24 = vpop.permute.xlu1 %814 }
 0x217   : > { %v820_v25 = vsel %vm460_vm2, %v813_v23, %v815_v24 }
 0x218   : > { %826 = vst [vmem:[#allocation3] sm:$0xf] %v820_v25 }
 0x21a   : > { %v949_v26 = vpop.permute.xlu1 %948 }
 0x21e   : > { %v2989_v27 = vpop.permute.xlu1 %816 }
 0x21f   : > { %v821_v28 = vsel %vm460_vm2, %v815_v24, %v2989_v27 }
 0x220   : > { %827 = vst [vmem:[#allocation3 + $0x8] sm:$0xf] %v821_v28 }
 0x222   : > { %v2993_v31 = vpop.permute.xlu1 %871 }
 0x225   : > { %v953_v32 = vpop.permute.xlu0 %952 }
 0x226   : > { %961 = vst.msk [vmem:[#allocation3 + $0x58] sm:$0xf] %vm798_vm10, %v953_v32 }
 0x228   : > { %v933_v33 = vpop.permute.xlu1 %932 }
 0x229   : > { %941 = vst.msk [vmem:[#allocation3 + $0x40] sm:$0xf0] %vm857_vm8, %v933_v33  ;;  %v870_v34 = vpop.permute.xlu0 %869 }
 0x22a   : > { %v875_v35 = vsel %vm521_vm4, %v868_v29, %v870_v34  ;;  %v876_v36 = vsel %vm521_vm4, %v870_v34, %v2993_v31  ;;  %v3037_v29 = vld [vmem:[#allocation2] sm:$0xff] }
 0x22b   : > { %881 = vst [vmem:[#allocation3 + $0x18] sm:$0xf] %v875_v35  ;;  %882 = vst [vmem:[#allocation3 + $0x20] sm:$0xf] %v876_v36  ;;  %1168 = vrot.lane.b32.xlu0 %v3037_v29, %s2739_s23  ;;  %1193 = vrot.lane.b32.xlu1 %v3037_v29, %s2740_s24 }
 0x22c   : > { %v951_v37 = vpop.permute.xlu1 %950 }
 0x22d   : > { %v954_v38 = vsel %vm608_vm9, %v949_v26, %v951_v37  ;;  %v955_v39 = vsel %vm608_vm9, %v951_v37, %v953_v32  ;;  %v976_v10 = vpop.permute.xlu0 %975 }
 0x22e   : > { %959 = vst [vmem:[#allocation3 + $0x48] sm:$0xf] %v954_v38  ;;  %960 = vst [vmem:[#allocation3 + $0x50] sm:$0xf] %v955_v39 }
 0x22f   : > { %984 = vst.msk [vmem:[#allocation3 + $0x58] sm:$0xf0] %vm857_vm8, %v976_v10  ;;  %1218 = vrot.lane.b32.xlu0 %v3037_v29, %s2742_s25 }
 0x230   : > { %v846_v40 = vpop.permute.xlu1 %845  ;;  %v1013_v25 = vld [vmem:[#allocation3 + $0x40] sm:$0xff] }
 0x231   : > { %v844_v41 = vpop.permute.xlu0 %843 }
 0x232   : > { %v849_v42 = vsel %vm490_vm3, %v842_v21, %v844_v41  ;;  %v850_v43 = vsel %vm490_vm3, %v844_v41, %v846_v40 }
 0x233   : > { %855 = vst [vmem:[#allocation3] sm:$0xf0] %v849_v42  ;;  %856 = vst [vmem:[#allocation3 + $0x8] sm:$0xf0] %v850_v43 }
 0x234   : > { %v901_v44 = vpop.permute.xlu1 %900 }
 0x235   : > { %v899_v45 = vpop.permute.xlu0 %898 }
 0x236   : > { %v904_v46 = vsel %vm552_vm5, %v897_v22, %v899_v45  ;;  %v905_v47 = vsel %vm552_vm5, %v899_v45, %v901_v44  ;;  %v2705_v22 = vld [vmem:[%s3647_s4] sm:$0xff]   ;;  %v1016_v26 = vld [vmem:[#allocation3 + $0x58] sm:$0xff] }
 0x237   : > { %910 = vst [vmem:[#allocation3 + $0x18] sm:$0xf0] %v904_v46  ;;  %911 = vst [vmem:[#allocation3 + $0x20] sm:$0xf0] %v905_v47 }
 0x238   : > { %v992_v48 = vpop.permute.xlu1 %991 }
 0x239   : > { %v929_v49 = vpop.permute.xlu0 %928 }
 0x23a   : > { %v1006_v50 = vld [vmem:[#allocation3 + $0x8] sm:$0xff]  ;;  %v1005_v51 = vld [vmem:[#allocation3] sm:$0xff] }
 0x23b   : > { %1049 = vmatprep.subr.bf16.mxu0 %v1006_v50 }
 0x23c   : > { %v974_v52 = vpop.permute.xlu1 %973  ;;  %1050 = vmatpush1.bf16.msra.mxu0 %v1005_v51 }
 0x23d   : > { %v978_v53 = vsel %vm632_vm11, %v974_v52, %v976_v10  ;;  %v931_v54 = vpop.permute.xlu0 %930 }
 0x23e   : > { %983 = vst [vmem:[#allocation3 + $0x50] sm:$0xf0] %v978_v53  ;;  %v934_v55 = vsel %vm584_vm7, %v929_v49, %v931_v54  ;;  %v935_v56 = vsel %vm584_vm7, %v931_v54, %v933_v33  ;;  %v1009_v58 = vld [vmem:[#allocation3 + $0x20] sm:$0xff]  ;;  %v1008_v59 = vld [vmem:[#allocation3 + $0x18] sm:$0xff] }
 0x23f   : > { %939 = vst [vmem:[#allocation3 + $0x30] sm:$0xf0] %v934_v55  ;;  %940 = vst [vmem:[#allocation3 + $0x38] sm:$0xf0] %v935_v56  ;;  %1051 = vmatprep.subr.bf16.mxu0 %v1009_v58 }
 0x240   : > { %v996_v60 = vpop.permute.xlu1 %995  ;;  %1052 = vmatpush1.bf16.msra.mxu0 %v1008_v59 }
 0x241   : > { %1004 = vst.msk [vmem:[#allocation3 + $0x70] sm:$0xf] %vm798_vm10, %v996_v60  ;;  %v972_v61 = vpop.permute.xlu0 %971 }
 0x242   : > { %v977_v63 = vsel %vm632_vm11, %v972_v61, %v974_v52 }
 0x243   : > { %982 = vst [vmem:[#allocation3 + $0x48] sm:$0xf0] %v977_v63 }
 0x244   : > { %v848_v0 = vpop.permute.xlu1 %847 }
 0x245   : > { %v851_v1 = vsel %vm490_vm3, %v846_v40, %v848_v0  ;;  %v994_v2 = vpop.permute.xlu0 %993  ;;  %v1015_v9 = vld [vmem:[#allocation3 + $0x50] sm:$0xff]  ;;  %v2706_v0 = vld [vmem:[%s3649_s6 + $0x4] ss:$8 sps:$4 sm:$0xff]  }
 0x246   : > { %858 = vst.msk [vmem:[#allocation3 + $0x10] sm:$0xf0] %vm857_vm8, %v851_v1  ;;  %v997_v3 = vsel %vm653_vm12, %v992_v48, %v994_v2  ;;  %v998_v4 = vsel %vm653_vm12, %v994_v2, %v996_v60  ;;  %v1012_v5 = vld [vmem:[#allocation3 + $0x38] sm:$0xff]  ;;  %v1011_v6 = vld [vmem:[#allocation3 + $0x30] sm:$0xff]  ;;  %v1156_v1 = vld [vmem:[%s3650_s7] sm:$0xff] }
 0x247   : > { %1002 = vst [vmem:[#allocation3 + $0x60] sm:$0xf] %v997_v3  ;;  %1003 = vst [vmem:[#allocation3 + $0x68] sm:$0xf] %v998_v4  ;;  %1053 = vmatprep.subr.bf16.mxu0 %v1012_v5  ;;  %v1157_v2 = vld [vmem:[%s3650_s7 + $0x8] sm:$0xff]  ;;  %v1158_v3 = vld [vmem:[%s3650_s7 + $0x10] sm:$0xff] }
 0x248   : > { %v903_v7 = vpop.permute.xlu1 %902  ;;  %1054 = vmatpush1.bf16.msra.mxu0 %v1011_v6  ;;  %v1159_v4 = vld [vmem:[%s3650_s7 + $0x18] sm:$0xff] }
 0x249   : > { %v906_v8 = vsel %vm552_vm5, %v901_v44, %v903_v7  ;;  %1055 = vmatprep.subr.bf16.mxu0 %v1015_v9  ;;  %v819_v11 = vpop.permute.xlu0 %818 }
 0x24a   : > { %912 = vst.msk [vmem:[#allocation3 + $0x28] sm:$0xf0] %vm857_vm8, %v906_v8  ;;  %v822_v13 = vsel %vm460_vm2, %v2989_v27, %v819_v11  ;;  %v1014_v15 = vld [vmem:[#allocation3 + $0x48] sm:$0xff]  ;;  %vm1035_vm8 = vcmask 588800   ;;  %v1019_v27 = vld [vmem:[#allocation3 + $0x70] sm:$0xf] }
 0x24b   : > { %828 = vst.msk [vmem:[#allocation3 + $0x10] sm:$0xf] %vm798_vm10, %v822_v13  ;;  %v1047_v28 = vsel %vm1039_vm6, %v1019_v27, 0 }
 0x24c   : > { %1056 = vmatpush1.bf16.msra.mxu0 %v1014_v15 }
 0x24d   : > { %v874_v17 = vpop.permute.xlu0 %873 }
 0x24e   : > { %v877_v18 = vsel %vm521_vm4, %v2993_v31, %v874_v17  ;;  %v1018_v19 = vld [vmem:[#allocation3 + $0x68] sm:$0xf]  ;;  %v1017_v20 = vld [vmem:[#allocation3 + $0x60] sm:$0xf] }
 0x24f   : > { %883 = vst.msk [vmem:[#allocation3 + $0x28] sm:$0xf] %vm798_vm10, %v877_v18  ;;  %2576 = vmatprep.subr.msk.bf16.mxu0 %vm1039_vm6, %v1018_v19  ;;  %v1041_v21 = vsel %vm1039_vm6, %v1017_v20, 0  ;;  %vm1150_vm6 = vcmask 556032   ;;  %vm1411_vm10 = vcmask 130048  }
 0x250   : > { %1058 = vmatpush1.bf16.msra.mxu0 %v1041_v21 }
 0x252   : > { %v1007_v23 = vld [vmem:[#allocation3 + $0x10] sm:$0xff] }
 0x253   : > { %2577 = vmatmul.mubr.msk.bf16.vlgmr.msra.gmra.mrb[4].mxu0 %vm1035_vm8, %v2705_v22  ;;  %2644 = vmatpush3.bf16.msra.mxu1 %v1007_v23 }
 0x254   : > { %2645 = vmatprep.subr.bf16.mxu1 %v2749_v62  ;;  %2583 = vmatprep.mubr.msk.bf16.mxu0 %vm1411_vm10, %v2706_v0 }
 0x256   : > { %v1010_v24 = vld [vmem:[#allocation3 + $0x28] sm:$0xff] }
 0x257   : > { %2646 = vmatpush3.bf16.msra.mxu1 %v1010_v24 }
 0x258   : > { %2647 = vmatprep.subr.bf16.mxu1 %v2749_v62 }
 0x259   : > { %v1028_v33 = vpop.permute.xlu1 %1027 }
 0x25b   : > { %2648 = vmatpush3.bf16.msra.mxu1 %v1013_v25 }
 0x25c   : > { %2649 = vmatprep.subr.bf16.mxu1 %v2749_v62 }
 0x25e   : > { %v1023_v31 = vpop.permute.xlu0 %1022 }
 0x25f   : > { %2650 = vmatpush3.bf16.msra.mxu1 %v1016_v26 }
 0x260   : > { %2651 = vmatprep.subr.bf16.mxu1 %v2749_v62 }
 0x263   : > { %2652 = vmatpush3.bf16.msra.mxu1 %v1047_v28 }
 0x264   : > { %1471 = vmatprep.subr.bf16.mxu1 %v2748_v57 }
 0x266   : > { %2654 = vmatmul.mubr.msk.bf16.vlgmr.msra.gmra.mrb[4].mxu1 %vm1035_vm8, %v2705_v22  ;;  %vm3141_vm8 = vmpackc.low %vm788_vm13, %vm788_vm13 }
 0x267   : > { %2585 = vmatprep.mubr.msk.bf16.mxu1 %vm1411_vm10, %v2706_v0 }
 0x29d   : > { %v1169_v5 = vpop.permute.xlu0 %1168  ;;  %v1194_v6 = vpop.permute.xlu1 %1193 }
 0x2a1   : > { %v1219_v7 = vpop.permute.xlu0 %1218 }
 0x326   : > { %v1083_v32 = vpop.f32.mrb[4].mxu0 }
 0x327   : > { %v3045_v34 = vadd.f32 %v1083_v32, %v1023_v31  ;;  %v1085_v35 = vpop.f32.mrb[5].mxu0 }
 0x328   : > { %v3047_v36 = vadd.f32 %v1085_v35, %v1023_v31  ;;  %v1087_v37 = vpop.f32.mrb[6].mxu0 }
 0x329   : > { %v1133_v38 = vmax.f32 %v3045_v34, 0.0  ;;  %v3050_v39 = vadd.f32 %v1087_v37, %v1028_v33  ;;  %v1089_v10 = vpop.f32.mrb[7].mxu0 }
 0x32a   : > { %v1134_v40 = vmax.f32 %v3047_v36, 0.0  ;;  %v3053_v41 = vadd.f32 %v1089_v10, %v1028_v33 }
 0x32b   : > { %v1136_v42 = vmax.f32 %v3050_v39, 0.0  ;;  %v1139_v44 = vsel %vm787_vm14, %v1133_v38, 0.0 }
 0x32c   : > { %v1137_v43 = vmax.f32 %v3053_v41, 0.0  ;;  %v1140_v46 = vsel %vm788_vm13, %v1134_v40, 0.0 }
 0x32d   : > { %v1142_v45 = vsel %vm787_vm14, %v1136_v42, 0.0  ;;  %v2717_v35 = vpack.c.bf16 %v1136_v42, %v1133_v38 }
 0x32e   : > { %v1145_v47 = vpack.c.bf16 %v1142_v45, %v1139_v44  ;;  %v1143_v48 = vsel %vm788_vm13, %v1137_v43, 0.0  ;;  %v2714_v32 = vpack.c.bf16 %v1137_v43, %v1134_v40 }
 0x32f   : > { %v1146_v49 = vpack.c.bf16 %v1143_v48, %v1140_v46 }
 0x330   : > { %1195 = vrot.lane.b32.xlu1 %v1145_v47, %s2740_s24  ;;  %1170 = vrot.lane.b32.xlu0 %v1145_v47, %s2739_s23 }
 0x334   : > { %1172 = vrot.lane.b32.xlu1 %v1146_v49, %s2739_s23  ;;  %1220 = vrot.lane.b32.xlu0 %v1145_v47, %s2742_s25 }
 0x338   : > { %1245 = vrot.lane.b32.xlu1 %v1145_v47, %s2743_s27  ;;  %1197 = vrot.lane.b32.xlu0 %v1146_v49, %s2740_s24 }
 0x339   : > { %v1126_v50 = vpop.f32.mrb[4].mxu1 }
 0x33a   : > { %v1127_v51 = vadd.f32 %v1126_v50, %v1023_v31  ;;  %v2655_v52 = vpop.f32.mrb[5].mxu1 }
 0x33b   : > { %v1129_v53 = vpop.f32.mrb[6].mxu1 }
 0x33c   : > { %v1135_v54 = vmax.f32 %v1127_v51, 0.0  ;;  %v1130_v55 = vadd.f32 %v1129_v53, %v1028_v33  ;;  %v2656_v56 = vpop.f32.mrb[7].mxu1  ;;  %1222 = vrot.lane.b32.xlu1 %v1146_v49, %s2742_s25  ;;  %1272 = vrot.lane.b32.xlu0 %v1145_v47, %s2744_s13 }
 0x33d   : > { %v2709_v56 = vld [vmem:[%s3649_s6 + $0x14] ss:$8 sps:$4 sm:$0xff]  }
 0x33e   : > { %v1138_v58 = vmax.f32 %v1130_v55, 0.0  ;;  %v1141_v59 = vsel %vm789_vm15, %v1135_v54, 0.0  ;;  %v2708_v55 = vld [vmem:[%s3649_s6] ss:$8 sps:$4 sm:$0xff]  }
 0x340   : > { %v1144_v60 = vsel %vm789_vm15, %v1138_v58, 0.0  ;;  %1243 = vrot.lane.b32.xlu1 %v3037_v29, %s2743_s27  ;;  %1247 = vrot.lane.b32.xlu0 %v1146_v49, %s2743_s27 }
 0x341   : > { %v1147_v61 = vpack.c.bf16 %v1144_v60, %v1141_v59 }
 0x343   : > { %1151 = vst.msk [vmem:[#allocation2 + $0x18] sm:$0xff] %vm1150_vm6, %v1147_v61 }
 0x34a   : > { %v1268_v63 = vld [vmem:[#allocation2 + $0x18] sm:$0xff] }
 0x34b   : > { %1276 = vrot.lane.b32.xlu1 %v1268_v63, %s2744_s13  ;;  %1296 = vrot.lane.b32.xlu0 %v1268_v63, %s2745_s14  ;;  %1265 = vst.msk [vmem:[#allocation3 + $0x70] sm:$0xff] %vm1150_vm6, %v1268_v63 }
 0x34f   : > { %1292 = vrot.lane.b32.xlu1 %v1145_v47, %s2745_s14  ;;  %1274 = vrot.lane.b32.xlu0 %v1146_v49, %s2744_s13 }
 0x353   : > { %1294 = vrot.lane.b32.xlu1 %v1146_v49, %s2745_s14  ;;  %1312 = vrot.lane.b32.xlu0 %v1145_v47, %s2746_s15 }
 0x357   : > { %1316 = vrot.lane.b32.xlu1 %v1268_v63, %s2746_s15  ;;  %1314 = vrot.lane.b32.xlu0 %v1146_v49, %s2746_s15 }
 0x35b   : > { %1334 = vrot.lane.b32.xlu1 %v1146_v49, %s2747_s16  ;;  %1336 = vrot.lane.b32.xlu0 %v1268_v63, %s2747_s16 }
 0x35f   : > { %1332 = vrot.lane.b32.xlu1 %v1145_v47, %s2747_s16  ;;  %1174 = vrot.lane.b32.xlu0 %v1268_v63, %s2739_s23 }
 0x363   : > { %1199 = vrot.lane.b32.xlu1 %v1268_v63, %s2740_s24  ;;  %1224 = vrot.lane.b32.xlu0 %v1268_v63, %s2742_s25 }
 0x367   : > { %1249 = vrot.lane.b32.xlu1 %v1268_v63, %s2743_s27  ;;  %1375 = vperm.xlu0 %2703, %v1156_v1  }
 0x36b   : > { %1380 = vperm.xlu1 %2704, %v1157_v2   ;;  %1385 = vperm.xlu0 %2703, %v1158_v3   ;;  %v2711_v2 = vld [vmem:[%s3649_s6 + $0x10] ss:$8 sps:$4 sm:$0xff]  }
 0x36f   : > { %1390 = vperm.xlu1 %2704, %v1159_v4   ;;  %1574 = vrot.lane.b32.xlu0 %v3037_v29, %s2739_s23 }
 0x373   : > { %1624 = vrot.lane.b32.xlu0 %v3037_v29, %s2740_s24 }
 0x377   : > { %1674 = vrot.lane.b32.xlu0 %v3037_v29, %s2742_s25 }
 0x37b   : > { %1724 = vrot.lane.b32.xlu0 %v3037_v29, %s2743_s27 }
 0x3a2   : > { %v1196_v8 = vpop.permute.xlu1 %1195  ;;  %v1171_v9 = vpop.permute.xlu0 %1170 }
 0x3a3   : > { %v1176_v17 = vsel %vm460_vm2, %v1169_v5, %v1171_v9  ;;  %v1201_v21 = vsel %vm490_vm3, %v1194_v6, %v1196_v8  ;;  %v1360_v6 = vld [vmem:[#allocation3 + $0x70] sm:$0xff] }
 0x3a6   : > { %v1173_v11 = vpop.permute.xlu1 %1172  ;;  %v1221_v13 = vpop.permute.xlu0 %1220 }
 0x3a7   : > { %v1177_v15 = vsel %vm460_vm2, %v1171_v9, %v1173_v11  ;;  %v1226_v25 = vsel %vm521_vm4, %v1219_v7, %v1221_v13 }
 0x3a8   : > { %1418 = vmatprep.subr.bf16.mxu0 %v1177_v15 }
 0x3a9   : > { %1419 = vmatpush1.bf16.msra.mxu0 %v1176_v17 }
 0x3aa   : > { %v1246_v18 = vpop.permute.xlu1 %1245  ;;  %v1198_v19 = vpop.permute.xlu0 %1197 }
 0x3ab   : > { %v1202_v20 = vsel %vm490_vm3, %v1196_v8, %v1198_v19 }
 0x3ac   : > { %1420 = vmatprep.subr.bf16.mxu0 %v1202_v20 }
 0x3ad   : > { %1421 = vmatpush1.bf16.msra.mxu0 %v1201_v21 }
 0x3ae   : > { %v1223_v22 = vpop.permute.xlu1 %1222  ;;  %v1273_v23 = vpop.permute.xlu0 %1272 }
 0x3af   : > { %v1227_v24 = vsel %vm521_vm4, %v1221_v13, %v1223_v22  ;;  %v1562_v13 = vld [vmem:[#allocation2 + $0x20] sm:$0xff] }
 0x3b0   : > { %1422 = vmatprep.subr.bf16.mxu0 %v1227_v24  ;;  %1582 = vrot.lane.b32.xlu1 %v1562_v13, %s2739_s23 }
 0x3b1   : > { %1423 = vmatpush1.bf16.msra.mxu0 %v1226_v25 }
 0x3b2   : > { %v1244_v26 = vpop.permute.xlu1 %1243  ;;  %v1248_v27 = vpop.permute.xlu0 %1247 }
 0x3b3   : > { %v1251_v28 = vsel %vm552_vm5, %v1244_v26, %v1246_v18  ;;  %v1252_v29 = vsel %vm552_vm5, %v1246_v18, %v1248_v27 }
 0x3b4   : > { %1424 = vmatprep.subr.bf16.mxu0 %v1252_v29  ;;  %1632 = vrot.lane.b32.xlu1 %v1562_v13, %s2740_s24 }
 0x3b5   : > { %1425 = vmatpush1.bf16.msra.mxu0 %v1251_v28 }
 0x3b6   : > { %2715 = vmatprep.subr.msk.bf16.mxu0 %vm3141_vm8, %v2714_v32 }
 0x3b8   : > { %1682 = vrot.lane.b32.xlu1 %v1562_v13, %s2742_s25 }
 0x3b9   : > { %2718 = vmatpush1.bf16.msk.msra.mxu0 %vm3154_vm0, %v2717_v35 }
 0x3bc   : > { %1732 = vrot.lane.b32.xlu1 %v1562_v13, %s2743_s27 }
 0x3bd   : > { %v1277_v36 = vpop.permute.xlu1 %1276  ;;  %v1297_v37 = vpop.permute.xlu0 %1296 }
 0x3be   : > { %1285 = vst.msk [vmem:[#allocation3 + $0x88] sm:$0xff] %vm1150_vm6, %v1277_v36  ;;  %1305 = vst.msk [vmem:[#allocation3 + $0xa0] sm:$0xff] %vm1150_vm6, %v1297_v37 }
 0x3c1   : > { %v1293_v10 = vpop.permute.xlu1 %1292  ;;  %v1275_v40 = vpop.permute.xlu0 %1274 }
 0x3c2   : > { %v1278_v41 = vsel %vm584_vm7, %v1273_v23, %v1275_v40  ;;  %v1279_v43 = vsel %vm584_vm7, %v1275_v40, %v1277_v36 }
 0x3c3   : > { %1428 = vmatprep.subr.bf16.mxu0 %v1279_v43 }
 0x3c4   : > { %1429 = vmatpush1.bf16.msra.mxu0 %v1278_v41 }
 0x3c5   : > { %v1295_v34 = vpop.permute.xlu1 %1294  ;;  %v1313_v39 = vpop.permute.xlu0 %1312  ;;  %v1363_v7 = vld [vmem:[#allocation3 + $0x88] sm:$0xff]  ;;  %v1366_v8 = vld [vmem:[#allocation3 + $0xa0] sm:$0xff] }
 0x3c6   : > { %v1298_v38 = vsel %vm608_vm9, %v1293_v10, %v1295_v34  ;;  %v1299_v42 = vsel %vm608_vm9, %v1295_v34, %v1297_v37 }
 0x3c7   : > { %1430 = vmatprep.subr.bf16.mxu0 %v1299_v42 }
 0x3c8   : > { %1431 = vmatpush1.bf16.msra.mxu0 %v1298_v38 }
 0x3c9   : > { %v1317_v44 = vpop.permute.xlu1 %1316  ;;  %v1315_v45 = vpop.permute.xlu0 %1314 }
 0x3ca   : > { %1325 = vst.msk [vmem:[#allocation3 + $0xb8] sm:$0xff] %vm1150_vm6, %v1317_v44  ;;  %v1318_v46 = vsel %vm632_vm11, %v1313_v39, %v1315_v45  ;;  %v1319_v47 = vsel %vm632_vm11, %v1315_v45, %v1317_v44 }
 0x3cb   : > { %1432 = vmatprep.subr.bf16.mxu0 %v1319_v47 }
 0x3cc   : > { %1433 = vmatpush1.bf16.msra.mxu0 %v1318_v46 }
 0x3cd   : > { %v1335_v48 = vpop.permute.xlu1 %1334  ;;  %v1337_v49 = vpop.permute.xlu0 %1336 }
 0x3ce   : > { %v1339_v50 = vsel %vm653_vm12, %v1335_v48, %v1337_v49  ;;  %1345 = vst.msk [vmem:[#allocation3 + $0xd0] sm:$0xff] %vm1150_vm6, %v1337_v49 }
 0x3cf   : > { %1434 = vmatprep.subr.bf16.mxu0 %v1339_v50 }
 0x3d1   : > { %v1333_v51 = vpop.permute.xlu1 %1332  ;;  %v1175_v52 = vpop.permute.xlu0 %1174  ;;  %v1369_v9 = vld [vmem:[#allocation3 + $0xb8] sm:$0xff] }
 0x3d2   : > { %v1338_v53 = vsel %vm653_vm12, %v1333_v51, %v1335_v48  ;;  %v1178_v54 = vsel %vm460_vm2, %v1173_v11, %v1175_v52 }
 0x3d3   : > { %1184 = vst.msk [vmem:[#allocation3 + $0x10] sm:$0xff] %vm1150_vm6, %v1178_v54  ;;  %1435 = vmatpush1.bf16.msra.mxu0 %v1338_v53 }
 0x3d5   : > { %v1200_v58 = vpop.permute.xlu1 %1199  ;;  %v1225_v59 = vpop.permute.xlu0 %1224  ;;  %v1372_v11 = vld [vmem:[#allocation3 + $0xd0] sm:$0xff] }
 0x3d6   : > { %v1203_v60 = vsel %vm490_vm3, %v1198_v19, %v1200_v58  ;;  %v1228_v61 = vsel %vm521_vm4, %v1223_v22, %v1225_v59  ;;  %1451 = vmatmul.mubr.bf16.vlgmr.msra.gmra.mrb[8].mxu0 %v2708_v55 }
 0x3d7   : > { %1209 = vst.msk [vmem:[#allocation3 + $0x28] sm:$0xff] %vm1150_vm6, %v1203_v60  ;;  %1234 = vst.msk [vmem:[#allocation3 + $0x40] sm:$0xff] %vm1150_vm6, %v1228_v61  ;;  %2584 = vmatprep.mubr.msk.bf16.mxu0 %vm1411_vm10, %v2709_v56 }
 0x3d9   : > { %v1250_v63 = vpop.permute.xlu1 %1249 }
 0x3da   : > { %v1253_v0 = vsel %vm552_vm5, %v1248_v27, %v1250_v63  ;;  %v1348_v1 = vld [vmem:[#allocation3 + $0x10] sm:$0xff] }
 0x3db   : > { %1259 = vst.msk [vmem:[#allocation3 + $0x58] sm:$0xff] %vm1150_vm6, %v1253_v0  ;;  %1472 = vmatpush1.bf16.msra.mxu1 %v1348_v1 }
 0x3dc   : > { %1473 = vmatprep.subr.bf16.mxu1 %v2748_v57 }
 0x3de   : > { %v1351_v3 = vld [vmem:[#allocation3 + $0x28] sm:$0xff]  ;;  %1461 = vmatmul.mubr.bf16.gmra.mrb[12].mxu0 %v2711_v2  ;;  %v1354_v4 = vld [vmem:[#allocation3 + $0x40] sm:$0xff] }
 0x3df   : > { %1474 = vmatpush1.bf16.msra.mxu1 %v1351_v3 }
 0x3e0   : > { %1475 = vmatprep.subr.bf16.mxu1 %v2748_v57 }
 0x3e2   : > { %v1357_v5 = vld [vmem:[#allocation3 + $0x58] sm:$0xff] }
 0x3e3   : > { %1476 = vmatpush1.bf16.msra.mxu1 %v1354_v4 }
 0x3e4   : > { %1477 = vmatprep.subr.bf16.mxu1 %v2748_v57 }
 0x3e6   : > { %v1376_v15 = vpop.permute.xlu0 %1375 }
 0x3e7   : > { %1478 = vmatpush1.bf16.msra.mxu1 %v1357_v5 }
 0x3e8   : > { %1479 = vmatprep.subr.bf16.mxu1 %v2748_v57 }
 0x3ea   : > { %v1381_v20 = vpop.permute.xlu1 %1380  ;;  %v1386_v36 = vpop.permute.xlu0 %1385 }
 0x3eb   : > { %1480 = vmatpush1.bf16.msra.mxu1 %v1360_v6 }
 0x3ec   : > { %1481 = vmatprep.subr.bf16.mxu1 %v2748_v57 }
 0x3ee   : > { %v1391_v38 = vpop.permute.xlu1 %1390 }
 0x3ef   : > { %1482 = vmatpush1.bf16.msra.mxu1 %v1363_v7 }
 0x3f0   : > { %1483 = vmatprep.subr.bf16.mxu1 %v2748_v57 }
 0x3f3   : > { %1484 = vmatpush1.bf16.msra.mxu1 %v1366_v8 }
 0x3f4   : > { %1485 = vmatprep.subr.bf16.mxu1 %v2748_v57 }
 0x3f7   : > { %1486 = vmatpush1.bf16.msra.mxu1 %v1369_v9 }
 0x3f8   : > { %1487 = vmatprep.subr.bf16.mxu1 %v2748_v57 }
 0x3fb   : > { %1488 = vmatpush1.bf16.msra.mxu1 %v1372_v11 }
 0x3fe   : > { %1504 = vmatmul.mubr.bf16.vlgmr.msra.gmra.mrb[8].mxu1 %v2708_v55 }
 0x3ff   : > { %2586 = vmatprep.mubr.msk.bf16.mxu1 %vm1411_vm10, %v2709_v56  ;;  %vm3670_vm10 = vcmask 556038  }
 0x406   : > { %1512 = vmatmul.mubr.bf16.gmra.mrb[12].mxu1 %v2711_v2 }
 0x4a9   : > { %v1452_v17 = vpop.f32.mrb[8].mxu0 }
 0x4aa   : > { %v3207_v18 = vadd.f32 %v1452_v17, %v1376_v15  ;;  %v1454_v19 = vpop.f32.mrb[9].mxu0 }
 0x4ab   : > { %v3209_v21 = vadd.f32 %v1454_v19, %v1376_v15  ;;  %v1456_v22 = vpop.f32.mrb[10].mxu0 }
 0x4ac   : > { %v1520_v23 = vmax.f32 %v3207_v18, 0.0  ;;  %v3212_v24 = vadd.f32 %v1456_v22, %v1381_v20  ;;  %v1458_v25 = vpop.f32.mrb[11].mxu0 }
 0x4ad   : > { %v1521_v26 = vmax.f32 %v3209_v21, 0.0  ;;  %v3215_v27 = vadd.f32 %v1458_v25, %v1381_v20 }
 0x4ae   : > { %v1523_v28 = vmax.f32 %v3212_v24, 0.0  ;;  %v1532_v32 = vsel %vm787_vm14, %v1520_v23, 0.0 }
 0x4af   : > { %v1524_v29 = vmax.f32 %v3215_v27, 0.0  ;;  %v1533_v37 = vsel %vm788_vm13, %v1521_v26, 0.0 }
 0x4b0   : > { %v1535_v35 = vsel %vm787_vm14, %v1523_v28, 0.0 }
 0x4b1   : > { %v3231_v10 = vpack.c.bf16 %v1535_v35, %v1532_v32  ;;  %v1536_v40 = vsel %vm788_vm13, %v1524_v29, 0.0  ;;  %v1462_v41 = vpop.f32.mrb[12].mxu0 }
 0x4b2   : > { %v3237_v43 = vpack.c.bf16 %v1536_v40, %v1533_v37  ;;  %v3239_v34 = vadd.f32 %v1462_v41, %v1386_v36  ;;  %v1464_v39 = vpop.f32.mrb[13].mxu0  ;;  %v1575_v37 = vpop.permute.xlu0 %1574  ;;  %v1557_v40 = vld [vmem:[%s3652_s9] sm:$0xf] }
 0x4b3   : > { %1550 = vst [vmem:[#allocation2 + $0x8] sm:$0xff] %v3231_v10  ;;  %v3242_v42 = vadd.f32 %v1464_v39, %v1386_v36  ;;  %v1466_v44 = vpop.f32.mrb[14].mxu0  ;;  %1576 = vrot.lane.b32.xlu0 %v3231_v10, %s2739_s23 }
 0x4b4   : > { %1551 = vst [vmem:[#allocation2 + $0x10] sm:$0xff] %v3237_v43  ;;  %v1526_v45 = vmax.f32 %v3239_v34, 0.0  ;;  %v3248_v46 = vadd.f32 %v1466_v44, %v1391_v38  ;;  %v1468_v47 = vpop.f32.mrb[15].mxu0 }
 0x4b5   : > { %v1527_v48 = vmax.f32 %v3242_v42, 0.0  ;;  %v3251_v49 = vadd.f32 %v1468_v47, %v1391_v38 }
 0x4b6   : > { %v1529_v50 = vmax.f32 %v3248_v46, 0.0  ;;  %v1538_v52 = vsel %vm787_vm14, %v1526_v45, 0.0  ;;  %v1625_v41 = vpop.permute.xlu0 %1624 }
 0x4b7   : > { %v1530_v51 = vmax.f32 %v3251_v49, 0.0  ;;  %1626 = vrot.lane.b32.xlu0 %v3231_v10, %s2740_s24  ;;  %v1539_v54 = vsel %vm788_vm13, %v1527_v48, 0.0 }
 0x4b8   : > { %v1541_v53 = vsel %vm787_vm14, %v1529_v50, 0.0 }
 0x4b9   : > { %v3269_v55 = vpack.c.bf16 %v1541_v53, %v1538_v52  ;;  %v1542_v56 = vsel %vm788_vm13, %v1530_v51, 0.0  ;;  %v3362_v52 = vld [vmem:[%s3651_s8] sm:$0x3f] }
 0x4ba   : > { %v3275_v58 = vpack.c.bf16 %v1542_v56, %v1539_v54  ;;  %v1675_v39 = vpop.permute.xlu0 %1674  ;;  %v3366_v53 = vrot.slane %v3362_v52, %v2834_v12 }
 0x4bb   : > { %1676 = vrot.lane.b32.xlu0 %v3231_v10, %s2742_s25 }
 0x4bf   : > { %1726 = vrot.lane.b32.xlu0 %v3231_v10, %s2743_s27 }
 0x4c3   : > { %1782 = vrot.lane.b32.xlu0 %v3231_v10, %s2744_s13 }
 0x4c7   : > { %1784 = vrot.lane.b32.xlu0 %v3237_v43, %s2744_s13 }
 0x4cb   : > { %1586 = vrot.lane.b32.xlu0 %v3275_v58, %s2739_s23 }
 0x4cf   : > { %1788 = vrot.lane.b32.xlu0 %v3269_v55, %s2744_s13 }
 0x4d1   : > { %v1505_v59 = vpop.f32.mrb[8].mxu1 }
 0x4d2   : > { %v1506_v60 = vadd.f32 %v1505_v59, %v1376_v15  ;;  %v1507_v61 = vpop.f32.mrb[9].mxu1  ;;  %v2005_v59 = vcombine.high %v3366_v53, %v3366_v53 }
 0x4d3   : > { %v1508_v63 = vpop.f32.mrb[10].mxu1  ;;  %1636 = vrot.lane.b32.xlu0 %v3275_v58, %s2740_s24 }
 0x4d4   : > { %v1522_v0 = vmax.f32 %v1506_v60, 0.0  ;;  %v1509_v1 = vadd.f32 %v1508_v63, %v1381_v20  ;;  %v1510_v2 = vpop.f32.mrb[11].mxu1  ;;  %2044 = vmatprep.mubr.bf16.mxu0 %v2005_v59  ;;  %2126 = vmatprep.mubr.bf16.mxu1 %v2005_v59 }
 0x4d6   : > { %v1525_v3 = vmax.f32 %v1509_v1, 0.0  ;;  %v1534_v4 = vsel %vm789_vm15, %v1522_v0, 0.0 }
 0x4d7   : > { %1824 = vrot.lane.b32.xlu0 %v3237_v43, %s2745_s14 }
 0x4d8   : > { %v1537_v5 = vsel %vm789_vm15, %v1525_v3, 0.0 }
 0x4d9   : > { %v1546_v6 = vpack.c.bf16 %v1537_v5, %v1534_v4  ;;  %v1513_v7 = vpop.f32.mrb[12].mxu1  ;;  %v1583_v4 = vpop.permute.xlu1 %1582 }
 0x4da   : > { %v1514_v8 = vadd.f32 %v1513_v7, %v1386_v36  ;;  %v1515_v9 = vpop.f32.mrb[13].mxu1 }
 0x4db   : > { %1552 = vst.msk [vmem:[#allocation2 + $0x18] sm:$0xff] %vm1150_vm6, %v1546_v6  ;;  %v1516_v11 = vpop.f32.mrb[14].mxu1  ;;  %1686 = vrot.lane.b32.xlu0 %v3275_v58, %s2742_s25 }
 0x4dc   : > { %v1528_v13 = vmax.f32 %v1514_v8, 0.0  ;;  %v1517_v15 = vadd.f32 %v1516_v11, %v1391_v38  ;;  %v1518_v17 = vpop.f32.mrb[15].mxu1  ;;  %v1725_v38 = vpop.permute.xlu0 %1724 }
 0x4dd   : > { %v1633_v7 = vpop.permute.xlu1 %1632 }
 0x4de   : > { %v1531_v19 = vmax.f32 %v1517_v15, 0.0  ;;  %v1540_v20 = vsel %vm789_vm15, %v1528_v13, 0.0 }
 0x4df   : > { %1822 = vrot.lane.b32.xlu0 %v3231_v10, %s2745_s14 }
 0x4e0   : > { %v1543_v22 = vsel %vm789_vm15, %v1531_v19, 0.0 }
 0x4e1   : > { %v1549_v25 = vpack.c.bf16 %v1543_v22, %v1540_v20  ;;  %v3398_v8 = vpop.permute.xlu1 %1682 }
 0x4e2   : > { %v1772_v32 = vld [vmem:[#allocation2 + $0x18] sm:$0xff] }
 0x4e3   : > { %1555 = vst.msk [vmem:[#allocation2 + $0x38] sm:$0xff] %vm1150_vm6, %v1549_v25  ;;  %1786 = vrot.lane.b32.xlu1 %v1772_v32, %s2744_s13  ;;  %1766 = vst.msk [vmem:[#allocation3 + $0xd0] sm:$0xff] %vm1150_vm6, %v1772_v32  ;;  %1736 = vrot.lane.b32.xlu0 %v3275_v58, %s2743_s27 }
 0x4e5   : > { %v3404_v11 = vpop.permute.xlu1 %1732 }
 0x4e7   : > { %1578 = vrot.lane.b32.xlu1 %v3237_v43, %s2739_s23  ;;  %1828 = vrot.lane.b32.xlu0 %v3269_v55, %s2745_s14 }
 0x4ea   : > { %v1956_v35 = vld [vmem:[#allocation3 + $0xd0] sm:$0xff]  ;;  %v1775_v36 = vld [vmem:[#allocation2 + $0x38] sm:$0xff] }
 0x4eb   : > { %2604 = vmatprep.subr.bf16.mxu1 %v1956_v35  ;;  %1628 = vrot.lane.b32.xlu1 %v3237_v43, %s2740_s24  ;;  %1769 = vst.msk [vmem:[#allocation3 + $0xe8] sm:$0xff] %vm1150_vm6, %v1775_v36 }
 0x4ec   : > { %1864 = vrot.lane.b32.xlu0 %v3237_v43, %s2746_s15 }
 0x4ef   : > { %1678 = vrot.lane.b32.xlu1 %v3237_v43, %s2742_s25 }
 0x4f0   : > { %1862 = vrot.lane.b32.xlu0 %v3231_v10, %s2746_s15 }
 0x4f3   : > { %1728 = vrot.lane.b32.xlu1 %v3237_v43, %s2743_s27 }
 0x4f4   : > { %1790 = vrot.lane.b32.xlu0 %v3275_v58, %s2744_s13 }
 0x4f7   : > { %1584 = vrot.lane.b32.xlu1 %v3269_v55, %s2739_s23 }
 0x4f8   : > { %1868 = vrot.lane.b32.xlu0 %v3269_v55, %s2746_s15 }
 0x4fb   : > { %1580 = vrot.lane.b32.xlu1 %v1772_v32, %s2739_s23 }
 0x4fc   : > { %1830 = vrot.lane.b32.xlu0 %v3275_v58, %s2745_s14 }
 0x4ff   : > { %1634 = vrot.lane.b32.xlu1 %v3269_v55, %s2740_s24 }
 0x500   : > { %1730 = vrot.lane.b32.xlu0 %v1772_v32, %s2743_s27 }
 0x503   : > { %1792 = vrot.lane.b32.xlu1 %v1775_v36, %s2744_s13 }
 0x504   : > { %1870 = vrot.lane.b32.xlu0 %v3275_v58, %s2746_s15 }
 0x507   : > { %1684 = vrot.lane.b32.xlu1 %v3269_v55, %s2742_s25 }
 0x508   : > { %1906 = vrot.lane.b32.xlu0 %v1772_v32, %s2747_s16 }
 0x50b   : > { %1734 = vrot.lane.b32.xlu1 %v3269_v55, %s2743_s27 }
 0x50c   : > { %1738 = vrot.lane.b32.xlu0 %v1775_v36, %s2743_s27 }
 0x50f   : > { %1588 = vrot.lane.b32.xlu1 %v1775_v36, %s2739_s23 }
 0x510   : > { %1912 = vrot.lane.b32.xlu0 %v1775_v36, %s2747_s16 }
 0x513   : > { %1826 = vrot.lane.b32.xlu1 %v1772_v32, %s2745_s14 }
 0x514   : > { %1986 = vperm.xlu0 %2703, %v1557_v40  }
 0x517   : > { %1630 = vrot.lane.b32.xlu1 %v1772_v32, %s2740_s24 }
 0x51b   : > { %1832 = vrot.lane.b32.xlu1 %v1775_v36, %s2745_s14 }
 0x51f   : > { %1638 = vrot.lane.b32.xlu1 %v1775_v36, %s2740_s24 }
 0x523   : > { %1866 = vrot.lane.b32.xlu1 %v1772_v32, %s2746_s15 }
 0x525   : > { %v1577_v44 = vpop.permute.xlu0 %1576 }
 0x526   : > { %v1590_v47 = vsel %vm460_vm2, %v1575_v37, %v1577_v44 }
 0x527   : > { %1680 = vrot.lane.b32.xlu1 %v1772_v32, %s2742_s25  ;;  %1602 = vst [vmem:[#allocation3] sm:$0xff] %v1590_v47 }
 0x529   : > { %v1627_v54 = vpop.permute.xlu0 %1626 }
 0x52a   : > { %v3369_v56 = vsel %vm490_vm3, %v1625_v41, %v1627_v54 }
 0x52b   : > { %1872 = vrot.lane.b32.xlu1 %v1775_v36, %s2746_s15  ;;  %1652 = vst [vmem:[#allocation3 + $0x30] sm:$0xff] %v3369_v56 }
 0x52d   : > { %v1677_v60 = vpop.permute.xlu0 %1676 }
 0x52e   : > { %v3376_v61 = vsel %vm521_vm4, %v1675_v39, %v1677_v60 }
 0x52f   : > { %1688 = vrot.lane.b32.xlu1 %v1775_v36, %s2742_s25  ;;  %1702 = vst [vmem:[#allocation3 + $0x60] sm:$0xff] %v3376_v61 }
 0x531   : > { %v1727_v63 = vpop.permute.xlu0 %1726 }
 0x532   : > { %v3381_v0 = vsel %vm552_vm5, %v1725_v38, %v1727_v63 }
 0x533   : > { %1904 = vrot.lane.b32.xlu1 %v3237_v43, %s2747_s16 }
 0x535   : > { %v1783_v1 = vpop.permute.xlu0 %1782 }
 0x537   : > { %1902 = vrot.lane.b32.xlu1 %v3231_v10, %s2747_s16 }
 0x539   : > { %v1785_v2 = vpop.permute.xlu0 %1784 }
 0x53a   : > { %v3388_v3 = vsel %vm584_vm7, %v1783_v1, %v1785_v2 }
 0x53b   : > { %1910 = vrot.lane.b32.xlu1 %v3275_v58, %s2747_s16 }
 0x53d   : > { %v3392_v5 = vpop.permute.xlu0 %1586 }
 0x53f   : > { %1908 = vrot.lane.b32.xlu1 %v3269_v55, %s2747_s16 }
 0x541   : > { %v1789_v6 = vpop.permute.xlu0 %1788 }
 0x545   : > { %v3396_v43 = vpop.permute.xlu0 %1636 }
 0x549   : > { %v3400_v10 = vpop.permute.xlu0 %1824 }
 0x54d   : > { %v3402_v9 = vpop.permute.xlu0 %1686 }
 0x551   : > { %v1823_v13 = vpop.permute.xlu0 %1822 }
 0x552   : > { %v3408_v58 = vsel %vm608_vm9, %v1823_v13, %v3400_v10 }
 0x555   : > { %v1787_v15 = vpop.permute.xlu1 %1786  ;;  %v3410_v17 = vpop.permute.xlu0 %1736 }
 0x556   : > { %v3413_v55 = vsel %vm584_vm7, %v1785_v2, %v1787_v15  ;;  %1806 = vst.msk [vmem:[#allocation3 + $0x100] sm:$0xff] %vm1150_vm6, %v1787_v15 }
 0x559   : > { %v1579_v19 = vpop.permute.xlu1 %1578  ;;  %v1829_v20 = vpop.permute.xlu0 %1828 }
 0x55a   : > { %v1591_v22 = vsel %vm460_vm2, %v1577_v44, %v1579_v19 }
 0x55b   : > { %1603 = vst [vmem:[#allocation3 + $0x8] sm:$0xff] %v1591_v22  ;;  %2012 = vmatprep.subr.bf16.mxu0 %v1591_v22 }
 0x55c   : > { %2013 = vmatpush1.bf16.msra.mxu0 %v1590_v47 }
 0x55d   : > { %v3417_v25 = vpop.permute.xlu1 %1628  ;;  %v1962_v18 = vld [vmem:[#allocation3 + $0x100] sm:$0xff] }
 0x55e   : > { %v1641_v32 = vsel %vm490_vm3, %v1627_v54, %v3417_v25  ;;  %v3421_v35 = vpop.permute.xlu0 %1864 }
 0x55f   : > { %1653 = vst [vmem:[#allocation3 + $0x38] sm:$0xff] %v1641_v32 }
 0x561   : > { %v3423_v36 = vpop.permute.xlu1 %1678 }
 0x562   : > { %v1691_v37 = vsel %vm521_vm4, %v1677_v60, %v3423_v36  ;;  %v1863_v40 = vpop.permute.xlu0 %1862 }
 0x563   : > { %1703 = vst [vmem:[#allocation3 + $0x68] sm:$0xff] %v1691_v37  ;;  %v3429_v41 = vsel %vm632_vm11, %v1863_v40, %v3421_v35 }
 0x565   : > { %v1729_v39 = vpop.permute.xlu1 %1728 }
 0x566   : > { %v1741_v38 = vsel %vm552_vm5, %v1727_v63, %v1729_v39  ;;  %v1791_v44 = vpop.permute.xlu0 %1790 }
 0x567   : > { %v3433_v47 = vsel %vm584_vm7, %v1789_v6, %v1791_v44 }
 0x569   : > { %v1585_v54 = vpop.permute.xlu1 %1584 }
 0x56a   : > { %v1593_v59 = vsel %vm460_vm2, %v1583_v4, %v1585_v54  ;;  %v1594_v1 = vsel %vm460_vm2, %v1585_v54, %v3392_v5  ;;  %v1869_v60 = vpop.permute.xlu0 %1868  ;;  %v1959_v54 = vld [vmem:[#allocation3 + $0xe8] sm:$0xff] }
 0x56b   : > { %1605 = vst [vmem:[#allocation3 + $0x18] sm:$0xff] %v1593_v59  ;;  %1606 = vst [vmem:[#allocation3 + $0x20] sm:$0xff] %v1594_v1  ;;  %2014 = vmatprep.subr.bf16.mxu0 %v1594_v1 }
 0x56c   : > { %2015 = vmatpush1.bf16.msra.mxu0 %v1593_v59 }
 0x56d   : > { %v1581_v2 = vpop.permute.xlu1 %1580  ;;  %2016 = vmatprep.subr.bf16.mxu0 %v1641_v32 }
 0x56e   : > { %v1592_v13 = vsel %vm460_vm2, %v1579_v19, %v1581_v2  ;;  %v3439_v63 = vpop.permute.xlu0 %1830 }
 0x56f   : > { %1604 = vst.msk [vmem:[#allocation3 + $0x10] sm:$0xff] %vm1150_vm6, %v1592_v13  ;;  %v3444_v6 = vsel %vm608_vm9, %v1829_v20, %v3439_v63 }
 0x570   : > { %2017 = vmatpush1.bf16.msra.mxu0 %v3369_v56 }
 0x571   : > { %v1635_v4 = vpop.permute.xlu1 %1634 }
 0x572   : > { %v1643_v15 = vsel %vm490_vm3, %v1633_v7, %v1635_v4  ;;  %v1644_v22 = vsel %vm490_vm3, %v1635_v4, %v3396_v43  ;;  %v1731_v40 = vpop.permute.xlu0 %1730 }
 0x573   : > { %1655 = vst [vmem:[#allocation3 + $0x48] sm:$0xff] %v1643_v15  ;;  %1656 = vst [vmem:[#allocation3 + $0x50] sm:$0xff] %v1644_v22  ;;  %2018 = vmatprep.subr.bf16.mxu0 %v1644_v22  ;;  %v1742_v19 = vsel %vm552_vm5, %v1729_v39, %v1731_v40 }
 0x574   : > { %2019 = vmatpush1.bf16.msra.mxu0 %v1643_v15  ;;  %1754 = vst.msk [vmem:[#allocation3 + $0xa0] sm:$0xff] %vm1150_vm6, %v1742_v19  ;;  %v1990_v19 = vcombine.high %v3362_v52, %v3362_v52 }
 0x575   : > { %v1793_v32 = vpop.permute.xlu1 %1792  ;;  %2020 = vmatprep.subr.bf16.mxu0 %v1691_v37 }
 0x576   : > { %1809 = vst.msk [vmem:[#allocation3 + $0x118] sm:$0xff] %vm1150_vm6, %v1793_v32  ;;  %v1797_v56 = vsel %vm584_vm7, %v1791_v44, %v1793_v32  ;;  %v1932_v20 = vld [vmem:[#allocation3 + $0x10] sm:$0xff]  ;;  %v3454_v7 = vpop.permute.xlu0 %1870 }
 0x577   : > { %2605 = vmatpush3.bf16.msra.mxu1 %v1932_v20  ;;  %v3458_v59 = vsel %vm632_vm11, %v1869_v60, %v3454_v7 }
 0x578   : > { %2606 = vmatprep.subr.bf16.mxu1 %v1959_v54  ;;  %2021 = vmatpush1.bf16.msra.mxu0 %v3376_v61  ;;  %v2004_v54 = vrot.slane %v1990_v19, %v2834_v12  ;;  %v2188_v12 = vld [vmem:[#allocation2] sm:$0x3] }
 0x579   : > { %v1685_v39 = vpop.permute.xlu1 %1684  ;;  %2196 = vrot.lane.b32.xlu1 %v2188_v12, %s2739_s23 }
 0x57a   : > { %v1693_v37 = vsel %vm521_vm4, %v3398_v8, %v1685_v39  ;;  %v1694_v1 = vsel %vm521_vm4, %v1685_v39, %v3402_v9  ;;  %v3465_v44 = vpop.permute.xlu0 %1906  ;;  %v2242_v39 = vld [vmem:[#allocation2] sm:$0x3] }
 0x57b   : > { %2022 = vmatprep.subr.bf16.mxu0 %v1694_v1  ;;  %1926 = vst.msk [vmem:[#allocation3 + $0x190] sm:$0xff] %vm1150_vm6, %v3465_v44  ;;  %v1950_v40 = vld [vmem:[#allocation3 + $0xa0] sm:$0xff] }
 0x57c   : > { %2023 = vmatpush1.bf16.msra.mxu0 %v1693_v37  ;;  %v2250_v37 = vrot.slane %v2242_v39, 4  ;;  %v2271_v1 = vld [vmem:[#allocation2] sm:$0x3] }
 0x57d   : > { %v1735_v2 = vpop.permute.xlu1 %1734  ;;  %2024 = vmatprep.subr.bf16.mxu0 %v1741_v38  ;;  %v1965_v33 = vld [vmem:[#allocation3 + $0x118] sm:$0xff] }
 0x57e   : > { %v1743_v60 = vsel %vm552_vm5, %v3404_v11, %v1735_v2  ;;  %v1744_v61 = vsel %vm552_vm5, %v1735_v2, %v3410_v17  ;;  %v1739_v13 = vpop.permute.xlu0 %1738  ;;  %2254 = vrot.lane.b32.xlu1 %v2250_v37, %s2742_s25  ;;  %v2279_v2 = vrot.slane %v2271_v1, 2 }
 0x57f   : > { %v1745_v8 = vsel %vm552_vm5, %v3410_v17, %v1739_v13  ;;  %v2723_v17 = vpack.c.bf16 %v1523_v28, %v1520_v23  ;;  %v2729_v23 = vpack.c.bf16 %v1529_v50, %v1526_v45 }
 0x580   : > { %2025 = vmatpush1.bf16.msra.mxu0 %v3381_v0  ;;  %1757 = vst.msk [vmem:[#allocation3 + $0xb8] sm:$0xff] %vm1150_vm6, %v1745_v8  ;;  %v2720_v0 = vpack.c.bf16 %v1524_v29, %v1521_v26  ;;  %v2726_v26 = vpack.c.bf16 %v1530_v51, %v1527_v48 }
 0x581   : > { %v1589_v4 = vpop.permute.xlu1 %1588  ;;  %2026 = vmatprep.subr.bf16.mxu0 %v1744_v61 }
 0x582   : > { %v1595_v15 = vsel %vm460_vm2, %v3392_v5, %v1589_v4  ;;  %v3479_v38 = vpop.permute.xlu0 %1912 }
 0x583   : > { %1607 = vst.msk [vmem:[#allocation3 + $0x28] sm:$0xff] %vm1150_vm6, %v1595_v15  ;;  %1929 = vst.msk [vmem:[#allocation3 + $0x1a8] sm:$0xff] %vm1150_vm6, %v3479_v38 }
 0x584   : > { %2027 = vmatpush1.bf16.msra.mxu0 %v1743_v60 }
 0x585   : > { %v1827_v11 = vpop.permute.xlu1 %1826  ;;  %2721 = vmatprep.subr.msk.bf16.mxu0 %vm3141_vm8, %v2720_v0 }
 0x586   : > { %v1835_v5 = vsel %vm608_vm9, %v3400_v10, %v1827_v11  ;;  %1846 = vst.msk [vmem:[#allocation3 + $0x130] sm:$0xff] %vm1150_vm6, %v1827_v11 }
 0x588   : > { %2724 = vmatpush1.bf16.msk.msra.mxu0 %vm3154_vm0, %v2723_v17 }
 0x589   : > { %v1631_v21 = vpop.permute.xlu1 %1630  ;;  %2727 = vmatprep.subr.msk.bf16.mxu0 %vm3141_vm8, %v2726_v26 }
 0x58a   : > { %v1642_v27 = vsel %vm490_vm3, %v3417_v25, %v1631_v21  ;;  %v1935_v29 = vld [vmem:[#allocation3 + $0x28] sm:$0xff] }
 0x58b   : > { %1654 = vst.msk [vmem:[#allocation3 + $0x40] sm:$0xff] %vm1150_vm6, %v1642_v27  ;;  %2607 = vmatpush3.bf16.msra.mxu1 %v1935_v29  ;;  %v1983_v52 = vld [vmem:[#allocation3 + $0x1a8] sm:$0xff] }
 0x58c   : > { %2608 = vmatprep.subr.bf16.mxu1 %v1962_v18  ;;  %2730 = vmatpush1.bf16.msk.msra.mxu0 %vm3154_vm0, %v2729_v23  ;;  %vm2008_vm0 = vcmask 261120  }
 0x58d   : > { %v1833_v24 = vpop.permute.xlu1 %1832  ;;  %2032 = vmatprep.subr.bf16.mxu0 %v3413_v55  ;;  %v1968_v51 = vld [vmem:[#allocation3 + $0x130] sm:$0xff] }
 0x58e   : > { %v1837_v31 = vsel %vm608_vm9, %v3439_v63, %v1833_v24  ;;  %1849 = vst.msk [vmem:[#allocation3 + $0x148] sm:$0xff] %vm1150_vm6, %v1833_v24 }
 0x590   : > { %2033 = vmatpush1.bf16.msra.mxu0 %v3388_v3 }
 0x591   : > { %v1639_v28 = vpop.permute.xlu1 %1638  ;;  %2034 = vmatprep.subr.bf16.mxu0 %v1797_v56 }
 0x592   : > { %v1645_v34 = vsel %vm490_vm3, %v3396_v43, %v1639_v28  ;;  %v1938_v42 = vld [vmem:[#allocation3 + $0x40] sm:$0xff] }
 0x593   : > { %1657 = vst.msk [vmem:[#allocation3 + $0x58] sm:$0xff] %vm1150_vm6, %v1645_v34  ;;  %2609 = vmatpush3.bf16.msra.mxu1 %v1938_v42  ;;  %v1987_v60 = vpop.permute.xlu0 %1986 }
 0x594   : > { %2610 = vmatprep.subr.bf16.mxu1 %v1965_v33  ;;  %2035 = vmatpush1.bf16.msra.mxu0 %v3433_v47 }
 0x595   : > { %v1867_v45 = vpop.permute.xlu1 %1866  ;;  %2036 = vmatprep.subr.bf16.mxu0 %v1835_v5  ;;  %v1971_v25 = vld [vmem:[#allocation3 + $0x148] sm:$0xff] }
 0x596   : > { %v1875_v46 = vsel %vm632_vm11, %v3421_v35, %v1867_v45  ;;  %1886 = vst.msk [vmem:[#allocation3 + $0x160] sm:$0xff] %vm1150_vm6, %v1867_v45 }
 0x598   : > { %2037 = vmatpush1.bf16.msra.mxu0 %v3408_v58 }
 0x599   : > { %v1681_v48 = vpop.permute.xlu1 %1680  ;;  %2038 = vmatprep.subr.bf16.mxu0 %v1837_v31 }
 0x59a   : > { %v1692_v49 = vsel %vm521_vm4, %v3423_v36, %v1681_v48  ;;  %v1941_v50 = vld [vmem:[#allocation3 + $0x58] sm:$0xff] }
 0x59b   : > { %1704 = vst.msk [vmem:[#allocation3 + $0x70] sm:$0xff] %vm1150_vm6, %v1692_v49  ;;  %2611 = vmatpush3.bf16.msra.mxu1 %v1941_v50 }
 0x59c   : > { %2612 = vmatprep.subr.bf16.mxu1 %v1968_v51  ;;  %2039 = vmatpush1.bf16.msra.mxu0 %v3444_v6 }
 0x59d   : > { %v1873_v3 = vpop.permute.xlu1 %1872  ;;  %2040 = vmatprep.subr.bf16.mxu0 %v1875_v46  ;;  %v1974_v63 = vld [vmem:[#allocation3 + $0x160] sm:$0xff] }
 0x59e   : > { %v1877_v43 = vsel %vm632_vm11, %v3454_v7, %v1873_v3  ;;  %1889 = vst.msk [vmem:[#allocation3 + $0x178] sm:$0xff] %vm1150_vm6, %v1873_v3  ;;  %v1953_v7 = vld [vmem:[#allocation3 + $0xb8] sm:$0xff] }
 0x5a0   : > { %2041 = vmatpush1.bf16.msra.mxu0 %v3429_v41 }
 0x5a1   : > { %v1689_v10 = vpop.permute.xlu1 %1688  ;;  %2042 = vmatprep.subr.bf16.mxu0 %v1877_v43 }
 0x5a2   : > { %v1695_v58 = vsel %vm521_vm4, %v3402_v9, %v1689_v10  ;;  %v1944_v55 = vld [vmem:[#allocation3 + $0x70] sm:$0xff] }
 0x5a3   : > { %1707 = vst.msk [vmem:[#allocation3 + $0x88] sm:$0xff] %vm1150_vm6, %v1695_v58  ;;  %2613 = vmatpush3.bf16.msra.mxu1 %v1944_v55  ;;  %vm3669_vm6 = vcmask 553988  }
 0x5a4   : > { %2614 = vmatprep.subr.bf16.mxu1 %v1971_v25  ;;  %2043 = vmatpush1.bf16.msra.mxu0 %v3458_v59  ;;  %v1980_v59 = vld [vmem:[#allocation3 + $0x190] sm:$0xff] }
 0x5a5   : > { %v1905_v35 = vpop.permute.xlu1 %1904  ;;  %v1977_v32 = vld [vmem:[#allocation3 + $0x178] sm:$0xff] }
 0x5a6   : > { %v1915_v36 = vsel %vm653_vm12, %v1905_v35, %v3465_v44 }
 0x5a7   : > { %2053 = vmatprep.subr.bf16.mxu0 %v1915_v36  ;;  %2045 = vmatmul.mubr.bf16.vlgmr.msra.gmra.mrb[16].mxu0 %v3366_v53 }
 0x5a8   : > { %2085 = vmatprep.mubr.bf16.mxu0 %v2748_v57 }
 0x5a9   : > { %v1903_v41 = vpop.permute.xlu1 %1902 }
 0x5aa   : > { %v1914_v9 = vsel %vm653_vm12, %v1903_v41, %v1905_v35  ;;  %v1947_v47 = vld [vmem:[#allocation3 + $0x88] sm:$0xff] }
 0x5ab   : > { %2615 = vmatpush3.bf16.msra.mxu1 %v1947_v47  ;;  %2054 = vmatpush1.bf16.msra.mxu0 %v1914_v9 }
 0x5ac   : > { %2616 = vmatprep.subr.bf16.mxu1 %v1974_v63 }
 0x5ad   : > { %v1911_v6 = vpop.permute.xlu1 %1910 }
 0x5ae   : > { %v1917_v22 = vsel %vm653_vm12, %v1911_v6, %v3479_v38 }
 0x5af   : > { %2617 = vmatpush3.bf16.msra.mxu1 %v1950_v40  ;;  %2055 = vmatprep.subr.bf16.mxu0 %v1917_v22 }
 0x5b0   : > { %2618 = vmatprep.subr.bf16.mxu1 %v1977_v32 }
 0x5b1   : > { %v1909_v56 = vpop.permute.xlu1 %1908 }
 0x5b2   : > { %v1916_v20 = vsel %vm653_vm12, %v1909_v56, %v1911_v6 }
 0x5b3   : > { %2619 = vmatpush3.bf16.msra.mxu1 %v1953_v7  ;;  %2056 = vmatpush1.bf16.msra.mxu0 %v1916_v20 }
 0x5b4   : > { %2657 = vmatprep.subr.bf16.mxu1 %v2749_v62 }
 0x5b6   : > { %2127 = vmatmul.mubr.bf16.vlgmr.msra.gmra.mrb[16].mxu1 %v3366_v53  ;;  %2587 = vmatmul.mubr.msk.bf16.vlgmr.msra.gmra.mrb[16].mxu0 %vm2008_vm0, %v2004_v54  ;;  %v2213_v53 = vld [vmem:[#allocation2] sm:$0x3] }
 0x5b7   : > { %2658 = vmatpush3.bf16.msra.mxu1 %v1980_v59  ;;  %2661 = vmatprep.mubr.msk.bf16.mxu1 %vm2750_vm1, %v2749_v62  ;;  %v2221_v44 = vrot.slane %v2213_v53, 6 }
 0x5b8   : > { %2659 = vmatprep.subr.bf16.mxu1 %v2749_v62 }
 0x5b9   : > { %2225 = vrot.lane.b32.xlu0 %v2221_v44, %s2740_s24 }
 0x5bb   : > { %2660 = vmatpush3.bf16.msra.mxu1 %v1983_v52 }
 0x5bd   : > { %2283 = vrot.lane.b32.xlu0 %v2279_v2, %s2743_s27 }
 0x5be   : > { %2662 = vmatmul.mubr.msk.bf16.vlgmr.msra.gmra.mrb[20].mxu1 %vm2008_vm0, %v2004_v54 }
 0x5bf   : > { %2453 = vmatprep.mubr.bf16.mxu1 %v2748_v57 }
 0x689   : > { %v2620_v61 = vpop.f32.mrb[16].mxu1  ;;  %v2087_v13 = vpop.f32.mrb[16].mxu0 }
 0x68a   : > { %v2621_v8 = vpop.f32.mrb[17].mxu1  ;;  %v2675_v57 = vadd.f32 %v2087_v13, %v1987_v60  ;;  %v2089_v4 = vpop.f32.mrb[17].mxu0 }
 0x68b   : > { %v2622_v15 = vadd.f32 %v2621_v8, %v2620_v61  ;;  %v2623_v38 = vpop.f32.mrb[18].mxu1  ;;  %v2676_v11 = vadd.f32 %v2089_v4, %v1987_v60  ;;  %v2091_v0 = vpop.f32.mrb[18].mxu0 }
 0x68c   : > { %v2624_v5 = vpop.f32.mrb[19].mxu1  ;;  %v2174_v17 = vmax.f32 %v2675_v57, 0.0  ;;  %v2092_v21 = vpop.f32.mrb[19].mxu0 }
 0x68d   : > { %v2175_v26 = vmax.f32 %v2676_v11, 0.0  ;;  %v2129_v23 = vadd.f32 %v2622_v15, %v1987_v60  ;;  %v2187_v15 = vld [vmem:[%s3654_s11] sm:$0x7]  ;;  %v2197_v5 = vpop.permute.xlu1 %2196  ;;  %v2226_v21 = vpop.permute.xlu0 %2225 }
 0x68e   : > { %v2177_v27 = vsel %vm787_vm14, %v2174_v17, 0.0  ;;  %vm3666_vm14 = vcmask 549888  }
 0x68f   : > { %v2180_v29 = vpack.c.bf16 %v2177_v27, %v2177_v27  ;;  %v2178_v18 = vsel %vm788_vm13, %v2175_v26, 0.0  ;;  %vm3667_vm13 = vmmov %vm3666_vm14 }
 0x690   : > { %v2181_v24 = vpack.c.bf16 %v2178_v18, %v2178_v18 }
 0x691   : > { %2183 = vst [vmem:[#allocation2 + $0x8] sm:$0x3] %v2180_v29  ;;  %v2168_v31 = vpop.f32.mrb[20].mxu1  ;;  %v2255_v17 = vpop.permute.xlu1 %2254 }
 0x692   : > { %v2169_v28 = vadd.f32 %v2168_v31, %v2129_v23  ;;  %2184 = vst [vmem:[#allocation2 + $0x10] sm:$0x3] %v2181_v24  ;;  %v2663_v34 = vpop.f32.mrb[21].mxu1  ;;  %v2284_v29 = vpop.permute.xlu0 %2283 }
 0x693   : > { %v2171_v42 = vpop.f32.mrb[22].mxu1 }
 0x694   : > { %v2176_v33 = vmax.f32 %v2169_v28, 0.0  ;;  %v2664_v45 = vpop.f32.mrb[23].mxu1 }
 0x696   : > { %v2179_v46 = vsel %vm789_vm15, %v2176_v33, 0.0  ;;  %vm3668_vm15 = vcmask 551938  }
 0x697   : > { %v2182_v48 = vpack.c.bf16 %v2179_v46, %v2179_v46 }
 0x698   : > { %v2189_v14 = vld [vmem:[#allocation2 + $0x8] sm:$0x3] }
 0x699   : > { %v2214_v49 = vld [vmem:[#allocation2 + $0x8] sm:$0x3]  ;;  %2185 = vst.msk [vmem:[#allocation2 + $0x18] sm:$0x3] %vm3666_vm14, %v2182_v48  ;;  %2198 = vrot.lane.b32.xlu1 %v2189_v14, %s2739_s23  ;;  %v2301_v3 = vld [vmem:[#allocation2 + $0x10] sm:$0x3] }
 0x69a   : > { %v2222_v16 = vrot.slane %v2214_v49, 6  ;;  %v2243_v50 = vld [vmem:[#allocation2 + $0x8] sm:$0x3]  ;;  %2304 = vst [vmem:[#allocation3 + $0x20] sm:$0x3] %v2301_v3 }
 0x69b   : > { %v2251_v51 = vrot.slane %v2243_v50, 4  ;;  %v2272_v10 = vld [vmem:[#allocation2 + $0x8] sm:$0x3]  ;;  %v2307_v40 = vld [vmem:[#allocation2 + $0x10] sm:$0x3] }
 0x69c   : > { %v2280_v55 = vrot.slane %v2272_v10, 2  ;;  %v2300_v25 = vld [vmem:[#allocation2 + $0x8] sm:$0x3]  ;;  %v2190_v19 = vld [vmem:[#allocation2 + $0x10] sm:$0x3]  ;;  %v2313_v56 = vrot.slane %v2307_v40, 6 }
 0x69d   : > { %2227 = vrot.lane.b32.xlu1 %v2222_v16, %s2740_s24  ;;  %v2306_v35 = vld [vmem:[#allocation2 + $0x8] sm:$0x3]  ;;  %2303 = vst [vmem:[#allocation3 + $0x18] sm:$0x3] %v2300_v25  ;;  %v2330_v20 = vld [vmem:[#allocation2 + $0x10] sm:$0x3] }
 0x69e   : > { %v2312_v47 = vrot.slane %v2306_v35, 6  ;;  %v2352_v63 = vld [vmem:[#allocation2 + $0x8] sm:$0x3]  ;;  %v2215_v54 = vld [vmem:[#allocation2 + $0x10] sm:$0x3]  ;;  %v2336_v59 = vrot.slane %v2330_v20, 4 }
 0x69f   : > { %v2358_v22 = vrot.slane %v2352_v63, 2  ;;  %v2329_v32 = vld [vmem:[#allocation2 + $0x8] sm:$0x3]  ;;  %v2353_v52 = vld [vmem:[#allocation2 + $0x10] sm:$0x3]  ;;  %v2223_v12 = vrot.slane %v2215_v54, 6 }
 0x6a0   : > { %v2308_v43 = vld [vmem:[#allocation2 + $0x18] sm:$0x3]  ;;  %v2335_v7 = vrot.slane %v2329_v32, 4  ;;  %v2244_v39 = vld [vmem:[#allocation2 + $0x10] sm:$0x3]  ;;  %v2359_v37 = vrot.slane %v2353_v52, 2 }
 0x6a1   : > { %v2314_v58 = vrot.slane %v2308_v43, 6  ;;  %2256 = vrot.lane.b32.xlu1 %v2251_v51, %s2742_s25  ;;  %v2331_v30 = vld [vmem:[#allocation2 + $0x18] sm:$0x3]  ;;  %v2252_v53 = vrot.slane %v2244_v39, 4  ;;  %v2273_v1 = vld [vmem:[#allocation2 + $0x10] sm:$0x3] }
 0x6a2   : > { %v2302_v36 = vld [vmem:[#allocation2 + $0x18] sm:$0x3]  ;;  %v2337_v41 = vrot.slane %v2331_v30, 4  ;;  %v2376_v44 = vld [vmem:[#allocation2 + $0x10] sm:$0x3]  ;;  %v2281_v2 = vrot.slane %v2273_v1, 2 }
 0x6a3   : > { %2319 = vrot.lane.b32.xlu0 %v2314_v58, %s2744_s13  ;;  %2305 = vst.msk [vmem:[#allocation3 + $0x28] sm:$0x3] %vm3667_vm13, %v2302_v36  ;;  %v2354_v9 = vld [vmem:[#allocation2 + $0x18] sm:$0x3]  ;;  %v2375_v13 = vld [vmem:[#allocation2 + $0x8] sm:$0x3] }
 0x6a4   : > { %v2360_v6 = vrot.slane %v2354_v9, 2  ;;  %v2191_v60 = vld [vmem:[#allocation2 + $0x18] sm:$0x3] }
 0x6a5   : > { %2285 = vrot.lane.b32.xlu1 %v2280_v55, %s2743_s27  ;;  %v2245_v61 = vld [vmem:[#allocation2 + $0x18] sm:$0x3] }
 0x6a6   : > { %v2253_v8 = vrot.slane %v2245_v61, 4  ;;  %v2377_v57 = vld [vmem:[#allocation2 + $0x18] sm:$0x3] }
 0x6a7   : > { %2342 = vrot.lane.b32.xlu0 %v2337_v41, %s2745_s14  ;;  %v2216_v4 = vld [vmem:[#allocation2 + $0x18] sm:$0x3] }
 0x6a8   : > { %v2224_v38 = vrot.slane %v2216_v4, 6  ;;  %v2274_v11 = vld [vmem:[#allocation2 + $0x18] sm:$0x3] }
 0x6a9   : > { %2315 = vrot.lane.b32.xlu1 %v2312_v47, %s2744_s13  ;;  %v2282_v0 = vrot.slane %v2274_v11, 2 }
 0x6ab   : > { %2365 = vrot.lane.b32.xlu0 %v2360_v6, %s2746_s15 }
 0x6ad   : > { %2361 = vrot.lane.b32.xlu1 %v2358_v22, %s2746_s15 }
 0x6af   : > { %2200 = vrot.lane.b32.xlu0 %v2190_v19, %s2739_s23 }
 0x6b1   : > { %2317 = vrot.lane.b32.xlu1 %v2313_v56, %s2744_s13 }
 0x6b3   : > { %2338 = vrot.lane.b32.xlu0 %v2335_v7, %s2745_s14 }
 0x6b5   : > { %2340 = vrot.lane.b32.xlu1 %v2336_v59, %s2745_s14 }
 0x6b7   : > { %2229 = vrot.lane.b32.xlu0 %v2223_v12, %s2740_s24 }
 0x6b9   : > { %2363 = vrot.lane.b32.xlu1 %v2359_v37, %s2746_s15 }
 0x6bb   : > { %2258 = vrot.lane.b32.xlu0 %v2252_v53, %s2742_s25 }
 0x6bd   : > { %2383 = vrot.lane.b32.xlu1 %v2376_v44, %s2747_s16 }
 0x6bf   : > { %2287 = vrot.lane.b32.xlu0 %v2281_v2, %s2743_s27 }
 0x6c1   : > { %2202 = vrot.lane.b32.xlu1 %v2191_v60, %s2739_s23 }
 0x6c3   : > { %2381 = vrot.lane.b32.xlu0 %v2375_v13, %s2747_s16  ;;  %v2186_v13 = vld [vmem:[%s3653_s10] sm:$0x3] }
 0x6c5   : > { %2260 = vrot.lane.b32.xlu1 %v2253_v8, %s2742_s25  ;;  %s2682_s25 = smul.u32 12, %s3682_s22 }
 0x6c7   : > { %2385 = vrot.lane.b32.xlu0 %v2377_v57, %s2747_s16  ;;  %s413_s16 = scalar_lea.vmem %s3655_s12, %s2682_s25 }
 0x6c9   : > { %2406 = vperm.xlu1 %2704, %v2187_v15  }
 0x6cb   : > { %2231 = vrot.lane.b32.xlu0 %v2224_v38, %s2740_s24 }
 0x6cf   : > { %2289 = vrot.lane.b32.xlu0 %v2282_v0, %s2743_s27 }
 0x70b   : > { %v2199_v26 = vpop.permute.xlu1 %2198 }
 0x70c   : > { %v2204_v27 = vsel %vm460_vm2, %v2197_v5, %v2199_v26 }
 0x70d   : > { %2210 = vst [vmem:[#allocation3] sm:$0x3] %v2204_v27 }
 0x70f   : > { %v2228_v18 = vpop.permute.xlu1 %2227 }
 0x710   : > { %v2233_v23 = vsel %vm490_vm3, %v2226_v21, %v2228_v18 }
 0x711   : > { %2239 = vst [vmem:[#allocation3] sm:$0xc] %v2233_v23 }
 0x713   : > { %v2257_v24 = vpop.permute.xlu1 %2256 }
 0x714   : > { %v2262_v31 = vsel %vm521_vm4, %v2255_v17, %v2257_v24 }
 0x715   : > { %v2320_v28 = vpop.permute.xlu0 %2319  ;;  %2268 = vst [vmem:[#allocation3] sm:$0x30] %v2262_v31 }
 0x716   : > { %2328 = vst.msk [vmem:[#allocation3 + $0x28] sm:$0xc] %vm3668_vm15, %v2320_v28 }
 0x717   : > { %v2286_v34 = vpop.permute.xlu1 %2285 }
 0x718   : > { %v2291_v42 = vsel %vm552_vm5, %v2284_v29, %v2286_v34 }
 0x719   : > { %v2343_v33 = vpop.permute.xlu0 %2342  ;;  %2297 = vst [vmem:[#allocation3] sm:$0xc0] %v2291_v42 }
 0x71a   : > { %2351 = vst.msk [vmem:[#allocation3 + $0x28] sm:$0x30] %vm3669_vm6, %v2343_v33 }
 0x71b   : > { %v2316_v45 = vpop.permute.xlu1 %2315 }
 0x71d   : > { %v2366_v46 = vpop.permute.xlu0 %2365 }
 0x71e   : > { %2374 = vst.msk [vmem:[#allocation3 + $0x28] sm:$0xc0] %vm3670_vm10, %v2366_v46 }
 0x71f   : > { %v2362_v48 = vpop.permute.xlu1 %2361 }
 0x720   : > { %v2395_v52 = vld [vmem:[#allocation3] sm:$0xff] }
 0x721   : > { %v2201_v14 = vpop.permute.xlu0 %2200 }
 0x722   : > { %v2205_v49 = vsel %vm460_vm2, %v2199_v26, %v2201_v14 }
 0x723   : > { %2211 = vst [vmem:[#allocation3 + $0x8] sm:$0x3] %v2205_v49  ;;  %v2318_v16 = vpop.permute.xlu1 %2317 }
 0x724   : > { %v2321_v50 = vsel %vm584_vm7, %v2316_v45, %v2318_v16  ;;  %v2322_v51 = vsel %vm584_vm7, %v2318_v16, %v2320_v28  ;;  %vm3671_vm7 = vmmov %vm3667_vm13 }
 0x725   : > { %v2339_v3 = vpop.permute.xlu0 %2338  ;;  %2326 = vst [vmem:[#allocation3 + $0x18] sm:$0xc] %v2321_v50  ;;  %2327 = vst [vmem:[#allocation3 + $0x20] sm:$0xc] %v2322_v51  ;;  %v2400_v57 = vld [vmem:[#allocation3 + $0x28] sm:$0xff] }
 0x727   : > { %v2341_v43 = vpop.permute.xlu1 %2340 }
 0x728   : > { %v2344_v10 = vsel %vm608_vm9, %v2339_v3, %v2341_v43  ;;  %v2345_v58 = vsel %vm608_vm9, %v2341_v43, %v2343_v33  ;;  %vm3672_vm9 = vmmov %vm3669_vm6 }
 0x729   : > { %v2230_v30 = vpop.permute.xlu0 %2229  ;;  %2349 = vst [vmem:[#allocation3 + $0x18] sm:$0x30] %v2344_v10  ;;  %2350 = vst [vmem:[#allocation3 + $0x20] sm:$0x30] %v2345_v58 }
 0x72a   : > { %v2234_v55 = vsel %vm490_vm3, %v2228_v18, %v2230_v30 }
 0x72b   : > { %2240 = vst [vmem:[#allocation3 + $0x8] sm:$0xc] %v2234_v55  ;;  %v2364_v25 = vpop.permute.xlu1 %2363 }
 0x72c   : > { %v2367_v35 = vsel %vm632_vm11, %v2362_v48, %v2364_v25  ;;  %v2368_v36 = vsel %vm632_vm11, %v2364_v25, %v2366_v46  ;;  %vm3673_vm11 = vmmov %vm3671_vm7 }
 0x72d   : > { %v2259_v41 = vpop.permute.xlu0 %2258  ;;  %2372 = vst [vmem:[#allocation3 + $0x18] sm:$0xc0] %v2367_v35  ;;  %2373 = vst [vmem:[#allocation3 + $0x20] sm:$0xc0] %v2368_v36 }
 0x72e   : > { %v2263_v9 = vsel %vm521_vm4, %v2257_v24, %v2259_v41 }
 0x72f   : > { %2269 = vst [vmem:[#allocation3 + $0x8] sm:$0x30] %v2263_v9  ;;  %v2384_v47 = vpop.permute.xlu1 %2383 }
 0x731   : > { %v2288_v63 = vpop.permute.xlu0 %2287 }
 0x732   : > { %v2292_v6 = vsel %vm552_vm5, %v2286_v34, %v2288_v63 }
 0x733   : > { %2298 = vst [vmem:[#allocation3 + $0x8] sm:$0xc0] %v2292_v6  ;;  %v2203_v22 = vpop.permute.xlu1 %2202 }
 0x734   : > { %v2206_v40 = vsel %vm460_vm2, %v2201_v14, %v2203_v22  ;;  %v2399_v12 = vld [vmem:[#allocation3 + $0x20] sm:$0xff]  ;;  %vm3674_vm2 = vmmov %vm3668_vm15  ;;  %v2398_v53 = vld [vmem:[#allocation3 + $0x18] sm:$0xff] }
 0x735   : > { %v2382_v19 = vpop.permute.xlu0 %2381  ;;  %2212 = vst.msk [vmem:[#allocation3 + $0x10] sm:$0x3] %vm3671_vm7, %v2206_v40 }
 0x736   : > { %v2387_v32 = vsel %vm653_vm12, %v2382_v19, %v2384_v47 }
 0x737   : > { %2392 = vst [vmem:[#allocation3 + $0x30] sm:$0x3] %v2387_v32  ;;  %v2261_v56 = vpop.permute.xlu1 %2260 }
 0x738   : > { %v2264_v20 = vsel %vm521_vm4, %v2259_v41, %v2261_v56  ;;  %vm3675_vm4 = vmmov %vm3670_vm10 }
 0x739   : > { %v2386_v7 = vpop.permute.xlu0 %2385  ;;  %2270 = vst.msk [vmem:[#allocation3 + $0x10] sm:$0x30] %vm3672_vm9, %v2264_v20 }
 0x73a   : > { %v2388_v54 = vsel %vm653_vm12, %v2384_v47, %v2386_v7  ;;  %2394 = vst.msk [vmem:[#allocation3 + $0x40] sm:$0x3] %vm3673_vm11, %v2386_v7  ;;  %v2396_v59 = vld [vmem:[#allocation3 + $0x8] sm:$0xff]  ;;  %vm3676_vm12 = vcmask 1041408  }
 0x73b   : > { %2393 = vst [vmem:[#allocation3 + $0x38] sm:$0x3] %v2388_v54  ;;  %2421 = vmatprep.subr.bf16.mxu1 %v2396_v59  ;;  %vm3677_vm8 = vmmov %vm3676_vm12 }
 0x73c   : > { %2422 = vmatpush1.bf16.msra.mxu1 %v2395_v52 }
 0x73d   : > { %2423 = vmatprep.subr.bf16.mxu1 %v2399_v12  ;;  %v2232_v39 = vpop.permute.xlu0 %2231 }
 0x73e   : > { %v2235_v37 = vsel %vm490_vm3, %v2230_v30, %v2232_v39  ;;  %v2401_v1 = vld [vmem:[#allocation3 + $0x30] sm:$0x3]  ;;  %vm3678_vm3 = vcmask 293888  }
 0x73f   : > { %2241 = vst.msk [vmem:[#allocation3 + $0x10] sm:$0xc] %vm3674_vm2, %v2235_v37  ;;  %v2413_v61 = vsel %vm3677_vm8, %v2401_v1, 0  ;;  %vm3680_vm0 = vmmov %vm3678_vm3 }
 0x740   : > { %2424 = vmatpush1.bf16.msra.mxu1 %v2398_v53 }
 0x741   : > { %v2290_v44 = vpop.permute.xlu0 %2289  ;;  %v2403_v4 = vld [vmem:[#allocation3 + $0x40] sm:$0x3] }
 0x742   : > { %v2293_v2 = vsel %vm552_vm5, %v2288_v63, %v2290_v44  ;;  %v2402_v60 = vld [vmem:[#allocation3 + $0x38] sm:$0x3]  ;;  %vm3679_vm5 = vmmov %vm3677_vm8 }
 0x743   : > { %2299 = vst.msk [vmem:[#allocation3 + $0x10] sm:$0xc0] %vm3675_vm4, %v2293_v2  ;;  %2589 = vmatprep.subr.msk.bf16.mxu1 %vm3676_vm12, %v2402_v60  ;;  %v2419_v15 = vsel %vm3679_vm5, %v2403_v4, 0 }
 0x744   : > { %2426 = vmatpush1.bf16.msra.mxu1 %v2413_v61 }
 0x745   : > { %2665 = vmatprep.subr.bf16.mxu1 %v2749_v62 }
 0x747   : > { %2590 = vmatmul.mubr.msk.bf16.vlgmr.msra.gmra.mrb[24].mxu1 %vm3678_vm3, %v2186_v13 }
 0x748   : > { %2671 = vmatprep.mubr.msk.bf16.mxu1 %vm2750_vm1, %v2749_v62  ;;  %v2407_v38 = vpop.permute.xlu1 %2406  ;;  %vm2507_vm1 = vcmask 550912  }
 0x74a   : > { %v2397_v8 = vld [vmem:[#allocation3 + $0x10] sm:$0xff] }
 0x74b   : > { %2666 = vmatpush3.bf16.msra.mxu1 %v2397_v8 }
 0x74c   : > { %2667 = vmatprep.subr.bf16.mxu1 %v2749_v62 }
 0x74f   : > { %2668 = vmatpush3.bf16.msra.mxu1 %v2400_v57 }
 0x750   : > { %2669 = vmatprep.subr.bf16.mxu1 %v2749_v62 }
 0x753   : > { %2670 = vmatpush3.bf16.msra.mxu1 %v2419_v15 }
 0x756   : > { %2672 = vmatmul.mubr.msk.bf16.vlgmr.msra.gmra.mrb[28].mxu1 %vm3680_vm0, %v2186_v13 }
 0x81a   : > { %v2455_v11 = vpop.f32.mrb[24].mxu1 }
 0x81b   : > { %v2456_v0 = vadd.f32 %v2455_v11, %v2407_v38  ;;  %v2457_v5 = vpop.f32.mrb[25].mxu1 }
 0x81c   : > { %v2458_v17 = vadd.f32 %v2457_v5, %v2407_v38  ;;  %v2459_v21 = vpop.f32.mrb[26].mxu1 }
 0x81d   : > { %v2460_v26 = vpop.f32.mrb[27].mxu1 }
 0x81e   : > { %v2504_v27 = vcombine.low %v2456_v0, %v2458_v17 }
 0x820   : > { %2506 = vst [vmem:[%s413_s16] sm:$0x77] %v2504_v27 }
 0x829   : > { %v2496_v62 = vpop.f32.mrb[28].mxu1 }
 0x82a   : > { %v2497_v29 = vadd.f32 %v2496_v62, %v2407_v38  ;;  %v2673_v18 = vpop.f32.mrb[29].mxu1 }
 0x82b   : > { %v2499_v23 = vpop.f32.mrb[30].mxu1 }
 0x82c   : > { %2508 = vst.msk [vmem:[%s413_s16 + $0x8] sm:$0x7] %vm2507_vm1, %v2497_v29  ;;  %v2674_v24 = vpop.f32.mrb[31].mxu1 }
 0x82d PF: > { %s22_s21 = sadd.s32 1, %s2737_s21  }
 0x82e   : > { %p19_p4 = scmp.ge.s32.totalorder %s22_s21, 4  }
 0x830   :  { %21 = sbr.rel (!%p19_p4) target bundleno = 1 (0x1), region = 98 }

</bundles_post_ra>
